<compile_context>
chip_gen: v6e
topology: v6e:2x2x1
jax: 0.10.0
libtpu: 0.0.40
codegen_flags: <defaults>
</compile_context>

<pallas_src>
import functools

import numpy as np
import jax
import jax.numpy as jnp
from jax.experimental import pallas as pl
from jax.experimental.pallas import tpu as pltpu


def _tree_sum(xs):
    """Balanced pairwise sum (avoids a long serial accumulation chain)."""
    xs = list(xs)
    while len(xs) > 1:
        nxt = [xs[i] + xs[i + 1] for i in range(0, len(xs) - 1, 2)]
        if len(xs) % 2:
            nxt.append(xs[-1])
        xs = nxt
    return xs[0]


# ----------------------------------------------------------------------------
# Fused Pallas kernel: one grid step == one Bt-wide batch tile's full forward.
# ----------------------------------------------------------------------------
def _actor_kernel(frame_ref, noise_ref,
                  w1_ref, cb1_ref, wr_ref, br_ref,
                  wmap_ref, fcb_ref, lng_ref, lnb_ref,
                  tw1_ref, tb1_ref, tw2_ref, tb2_ref, tw3_ref, tb3_ref,
                  out_ref,
                  *, W0, L_list, n_rest, F, A, Bt, log_std_min, log_std_max):
    f32 = jnp.float32
    dt = w1_ref.dtype                        # matmul operand dtype (f32 or bf16)

    # ---- conv1: stride-2 3x3 conv expressed as 4 taps over the space-to-depth
    # frame.  Taps AND the batch tile are folded into ONE MXU matmul:
    # rows = 4*C0 (tap-major stacked channels), lanes = Bt*L1.
    L1 = L_list[0]
    shifts1 = (0, 1, W0, W0 + 1)
    frame = frame_ref[...]                                   # (Bt, C0, S0)
    stk = jnp.concatenate(
        [jnp.concatenate([frame[b, :, s:s + L1] for b in range(Bt)], axis=1)
         for s in shifts1], axis=0)                          # (4*C0, Bt*L1)
    acc = jnp.dot(w1_ref[...], stk, preferred_element_type=f32)
    h = jnp.maximum(acc + cb1_ref[...], 0.0)                 # (F, Bt*L1) f32

    # ---- remaining stride-1 3x3 convs: 9 taps folded into the contraction dim
    # -> one (F, 9F) x (9F, Bt*Lout) matmul per layer.
    shifts9 = tuple(kh * W0 + kw for kh in range(3) for kw in range(3))
    for l in range(n_rest):
        Lp, Ln = L_list[l], L_list[l + 1]
        hb = h.astype(dt)
        stk = jnp.concatenate(
            [jnp.concatenate([hb[:, b * Lp + s:b * Lp + s + Ln]
                              for b in range(Bt)], axis=1)
             for s in shifts9], axis=0)                      # (9*F, Bt*Ln)
        acc = jnp.dot(wr_ref[l], stk, preferred_element_type=f32)
        h = jnp.maximum(acc + br_ref[l], 0.0)                # (F, Bt*Ln) f32

    # ---- encoder fc (+ torch NCHW flatten folded into wmap) + LayerNorm.
    # F independent (Bt, Lf) x (Lf, feat) matmuls, tree-summed (no serial
    # M=1 accumulation chain; each dot has M = Bt on the MXU).
    Lf = L_list[-1]
    hb = h.astype(dt)
    parts = []
    for f in range(F):
        a_f = jnp.concatenate([hb[f:f + 1, b * Lf:(b + 1) * Lf]
                               for b in range(Bt)], axis=0)  # (Bt, Lf)
        parts.append(jnp.dot(a_f, wmap_ref[f], preferred_element_type=f32))
    z = _tree_sum(parts) + fcb_ref[...]                      # (Bt, feat) f32

    mean = jnp.mean(z, axis=-1, keepdims=True)
    var = jnp.mean((z - mean) ** 2, axis=-1, keepdims=True)
    feat = (z - mean) * jax.lax.rsqrt(var + 1e-5)            # PyTorch LN eps
    feat = feat * lng_ref[...] + lnb_ref[...]                # output_logits=True

    # ---- trunk MLP, batched over the tile (M = Bt on the MXU).
    y = jnp.maximum(jnp.dot(feat.astype(dt), tw1_ref[...],
                            preferred_element_type=f32) + tb1_ref[...], 0.0)
    y = jnp.maximum(jnp.dot(y.astype(dt), tw2_ref[...],
                            preferred_element_type=f32) + tb2_ref[...], 0.0)
    o3 = jnp.dot(y.astype(dt), tw3_ref[...],
                 preferred_element_type=f32) + tb3_ref[...]  # (Bt, 2A) f32

    mu = o3[:, :A]
    log_std = jnp.tanh(o3[:, A:])
    log_std = log_std_min + 0.5 * (log_std_max - log_std_min) * (log_std + 1.0)
    std = jnp.exp(log_std)

    noise = noise_ref[:, 0, :]                               # (Bt, A) f32
    pi = mu + noise * std

    # gaussian_logprob (f32 tail)
    log_pi = jnp.sum(-0.5 * noise * noise - log_std, axis=-1, keepdims=True)
    log_pi = log_pi - 0.5 * float(np.log(2.0 * np.pi)) * A

    # squash
    mu_t = jnp.tanh(mu)
    pi_t = jnp.tanh(pi)
    log_pi = log_pi - jnp.sum(
        jnp.log(jnp.maximum(1.0 - pi_t * pi_t, 0.0) + 1e-6),
        axis=-1, keepdims=True)

    # single packed store per tile: [mu | pi | log_std | log_pi]
    out_ref[:, 0, :] = jnp.concatenate([mu_t, pi_t, log_std, log_pi], axis=-1)


# ----------------------------------------------------------------------------
# Wrapper-side glue
# ----------------------------------------------------------------------------
def obs_to_frames(obs):
    """NCHW obs -> space-to-depth frame (B, 4C, (H/2)*(W/2)).

    Channel order is (ph, pw, c); spatial column index is i*(W/2)+j for the
    2x2-decimated pixel (i, j).  /255 is folded into the conv1 weights.
    """
    B, C, H, W = obs.shape
    x = obs.astype(jnp.float32).reshape(B, C, H // 2, 2, W // 2, 2)
    x = jnp.transpose(x, (0, 3, 5, 1, 2, 4))                 # (B, ph, pw, C, H/2, W/2)
    return x.reshape(B, 4 * C, (H // 2) * (W // 2))


def _const_spec(shape):
    # Grid-constant (weight) input: same block every step, stays VMEM-resident.
    # TODO(synk): at realistic sizes add pipeline_mode=pl.Buffered(1) to
    # single-buffer these never-changing blocks and halve their VMEM cost.
    n = len(shape)
    return pl.BlockSpec(shape, lambda i, _n=n: (0,) * _n)


def _pick_batch_tile(B, cap=32):
    """Largest divisor of B that is <= cap (cap ~32 for v7x's 64 MiB VMEM)."""
    bt = 1
    for d in range(1, min(B, cap) + 1):
        if B % d == 0:
            bt = d
    return bt


def actor_forward(kp, obs, noise, batch_tile=None):
    cfg = kp["cfg"]
    A = cfg["A"]
    B = obs.shape[0]
    Bt = _pick_batch_tile(B) if batch_tile is None else batch_tile
    assert B % Bt == 0

    dt = kp["w1"].dtype
    frames = obs_to_frames(obs).astype(dt)                   # (B, C0, S0)
    noise3 = noise.astype(jnp.float32).reshape(B, 1, A)

    kernel = functools.partial(
        _actor_kernel, W0=cfg["W0"], L_list=cfg["L_list"], n_rest=cfg["n_rest"],
        F=cfg["F"], A=A, Bt=Bt,
        log_std_min=cfg["log_std_min"], log_std_max=cfg["log_std_max"])

    weights = (kp["w1"], kp["cb1"], kp["wrest"], kp["brest"],
               kp["wmap"], kp["fc_b"], kp["ln_g"], kp["ln_b"],
               kp["tw1"], kp["tb1"], kp["tw2"], kp["tb2"], kp["tw3"], kp["tb3"])

    in_specs = [
        pl.BlockSpec((Bt,) + frames.shape[1:], lambda i: (i, 0, 0)),
        pl.BlockSpec((Bt, 1, A), lambda i: (i, 0, 0)),
    ] + [_const_spec(tuple(w.shape)) for w in weights]
    out_specs = pl.BlockSpec((Bt, 1, 3 * A + 1), lambda i: (i, 0, 0))

    # rough cost hint for the XLA scheduler
    L = cfg["L_list"]
    F = cfg["F"]
    C0 = frames.shape[1]
    feat_dim = kp["fc_b"].shape[-1]
    hid = kp["tb1"].shape[-1]
    flops_per_obs = (2 * F * 4 * C0 * L[0]
                     + sum(2 * F * 9 * F * L[i + 1] for i in range(cfg["n_rest"]))
                     + 2 * F * L[-1] * feat_dim
                     + 2 * (feat_dim * hid + hid * hid + hid * 2 * A))
    bytes_accessed = (sum(int(a.size) * int(np.dtype(a.dtype).itemsize)
                          for a in (frames, noise3) + weights)
                      + 4 * B * (3 * A + 1))
    cost = pl.CostEstimate(flops=int(B * flops_per_obs),
                           transcendentals=int(B * (4 * A + 4)),
                           bytes_accessed=int(bytes_accessed))

    out = pl.pallas_call(
        kernel,
        grid=(B // Bt,),
        out_shape=jax.ShapeDtypeStruct((B, 1, 3 * A + 1), jnp.float32),
        in_specs=in_specs,
        out_specs=out_specs,
        compiler_params=pltpu.CompilerParams(
            dimension_semantics=("parallel",),
            vmem_limit_bytes=32 * 1024 * 1024),
        cost_estimate=cost,
    )(frames, noise3, *weights)

    out = out[:, 0, :]
    mu = out[:, :A]
    pi = out[:, A:2 * A]
    log_std = out[:, 2 * A:3 * A]
    log_pi = out[:, 3 * A:]
    return mu, pi, log_pi, log_std


# ----------------------------------------------------------------------------
# Torch-layout params -> fused-kernel layout (matmul_dtype = f32 or bf16)
# ----------------------------------------------------------------------------
def prepare_params(tp, obs_shape, log_std_min, log_std_max,
                   matmul_dtype=jnp.float32):
    dt = matmul_dtype
    C, H, W = obs_shape
    assert H % 2 == 0 and W % 2 == 0
    convs = tp["convs"]
    num_layers = len(convs)
    assert num_layers >= 2
    F = int(convs[0][0].shape[0])
    H0, W0 = H // 2, W // 2
    S0 = H0 * W0

    # conv1 (stride 2, k=3) -> 4 s2d taps folded into one (F, 4*4C) matmul
    # weight; /255 folded in as well.
    w0, b0, s0 = convs[0]
    assert s0 == 2 and w0.shape[2] == 3
    w0p = jnp.pad(w0, ((0, 0), (0, 0), (0, 1), (0, 1)))           # (F, C, 4, 4)
    w0p = w0p.reshape(F, C, 2, 2, 2, 2)                           # (f, c, th, ph, tw, pw)
    w1tap = jnp.transpose(w0p, (2, 4, 0, 3, 5, 1)).reshape(4, F, 4 * C) / 255.0
    w1 = jnp.transpose(w1tap, (1, 0, 2)).reshape(F, 4 * 4 * C).astype(dt)
    cb1 = b0.reshape(F, 1)

    OH = (H - 3) // 2 + 1
    OW = (W - 3) // 2 + 1
    L_list = [S0 - (W0 + 1)]

    wrest, brest = [], []
    for (w, b, st) in convs[1:]:
        assert st == 1 and w.shape[2] == 3 and w.shape[0] == F and w.shape[1] == F
        wrest.append(jnp.transpose(w, (2, 3, 0, 1)).reshape(9, F, F))
        brest.append(b.reshape(F, 1))
        OH -= 2
        OW -= 2
        L_list.append(L_list[-1] - (2 * W0 + 2))
    assert OH >= 1 and OW >= 1
    R = num_layers - 1
    wrest = jnp.stack(wrest)                                      # (R, 9, F, F)
    wrest = jnp.transpose(wrest, (0, 2, 1, 3)).reshape(R, F, 9 * F).astype(dt)
    brest = jnp.stack(brest)                                      # (R, F, 1)

    # encoder fc: fold the torch NCHW flatten (f, oh, ow) into wmap[f, oh*W0+ow, :]
    feat = int(tp["fc_w"].shape[0])
    Lf = L_list[-1]
    wr = tp["fc_w"].reshape(feat, F, OH, OW)
    wr = jnp.transpose(wr, (1, 2, 3, 0))                          # (F, OH, OW, feat)
    wr = jnp.pad(wr, ((0, 0), (0, 0), (0, W0 - OW), (0, 0)))      # (F, OH, W0, feat)
    wmap = wr.reshape(F, OH * W0, feat)[:, :Lf, :].astype(dt)

    A = int(tp["w3"].shape[0]) // 2
    kp = dict(
        w1=w1, cb1=cb1, wrest=wrest, brest=brest,
        wmap=wmap,
        fc_b=tp["fc_b"].reshape(1, feat),
        ln_g=tp["ln_g"].reshape(1, feat),
        ln_b=tp["ln_b"].reshape(1, feat),
        tw1=tp["w1"].T.astype(dt), tb1=tp["b1"].reshape(1, -1),
        tw2=tp["w2"].T.astype(dt), tb2=tp["b2"].reshape(1, -1),
        tw3=tp["w3"].T.astype(dt), tb3=tp["b3"].reshape(1, -1),
        cfg=dict(W0=W0, L_list=tuple(int(x) for x in L_list),
                 n_rest=num_layers - 1, F=F, A=A,
                 log_std_min=float(log_std_min), log_std_max=float(log_std_max)),
    )
    return kp


# ----------------------------------------------------------------------------
# Deterministic torch-layout parameter init (mirrors weight_init)
# ----------------------------------------------------------------------------
def orthogonal(key, rows, cols, gain=1.0):
    big, small = max(rows, cols), min(rows, cols)
    a = jax.random.normal(key, (big, small), dtype=jnp.float32)
    q, r = jnp.linalg.qr(a)
    q = q * jnp.sign(jnp.diagonal(r))[None, :]
    if rows < cols:
        q = q.T
    return (gain * q).astype(jnp.float32)


def init_actor_params_torch(key, obs_shape, action_dim, hidden_dim,
                            num_layers, num_filters, feature_dim):
    C, H, W = obs_shape
    keys = jax.random.split(key, num_layers + 4)
    gain_relu = float(np.sqrt(2.0))                   # calculate_gain('relu')
    convs = []
    in_c, h_sp, w_sp = C, H, W
    k = 3
    for i in range(num_layers):
        stride = 2 if i == 0 else 1
        wt = jnp.zeros((num_filters, in_c, k, k), jnp.float32)
        center = orthogonal(keys[i], num_filters, in_c, gain=gain_relu)
        wt = wt.at[:, :, k // 2, k // 2].set(center)  # conv init: zero except center
        convs.append((wt, jnp.zeros((num_filters,), jnp.float32), stride))
        in_c = num_filters
        h_sp = (h_sp - k) // stride + 1
        w_sp = (w_sp - k) // stride + 1
    flat_dim = num_filters * h_sp * w_sp
    return {
        "convs": convs,
        "fc_w": orthogonal(keys[num_layers + 0], feature_dim, flat_dim),  # (out, in)
        "fc_b": jnp.zeros((feature_dim,), jnp.float32),
        "ln_g": jnp.ones((feature_dim,), jnp.float32),
        "ln_b": jnp.zeros((feature_dim,), jnp.float32),
        "w1": orthogonal(keys[num_layers + 1], hidden_dim, feature_dim),
        "b1": jnp.zeros((hidden_dim,), jnp.float32),
        "w2": orthogonal(keys[num_layers + 2], hidden_dim, hidden_dim),
        "b2": jnp.zeros((hidden_dim,), jnp.float32),
        "w3": orthogonal(keys[num_layers + 3], 2 * action_dim, hidden_dim),
        "b3": jnp.zeros((2 * action_dim,), jnp.float32),
    }


# ----------------------------------------------------------------------------
# Pure-JAX reference of the PyTorch module.  matmul_dtype mirrors the kernel's
# cast points (operands to every matmul cast to that dtype, f32 accumulation,
# /255 folded into the first conv weight), so bf16 can be checked tightly too.
# ----------------------------------------------------------------------------
def ref_actor_forward(tp, obs, noise, log_std_min, log_std_max,
                      matmul_dtype=jnp.float32):
    dt = matmul_dtype
    f32 = jnp.float32
    x = obs.astype(f32)
    for li, (w, b, stride) in enumerate(tp["convs"]):
        scale = (1.0 / 255.0) if li == 0 else 1.0
        Fo, Ci, k, _ = w.shape
        Bn, Cn, Hn, Wn = x.shape
        OH = (Hn - k) // stride + 1
        OW = (Wn - k) // stride + 1
        cols = []
        for kh in range(k):
            for kw in range(k):
                cols.append(x[:, :, kh:kh + stride * OH:stride,
                              kw:kw + stride * OW:stride])
        p = jnp.stack(cols, axis=2)                       # (Bn, Cn, k*k, OH, OW)
        p = p.transpose(0, 3, 4, 1, 2).reshape(Bn * OH * OW, Cn * k * k)
        wq = (w * scale).reshape(Fo, -1)
        y = jnp.dot(p.astype(dt), wq.astype(dt).T, preferred_element_type=f32) + b
        y = jnp.maximum(y, 0.0)
        x = y.reshape(Bn, OH, OW, Fo).transpose(0, 3, 1, 2)
    Bn = x.shape[0]
    flat = x.reshape(Bn, -1)
    z = jnp.dot(flat.astype(dt), tp["fc_w"].astype(dt).T,
                preferred_element_type=f32) + tp["fc_b"]
    mean = z.mean(-1, keepdims=True)
    var = ((z - mean) ** 2).mean(-1, keepdims=True)
    feat = (z - mean) / jnp.sqrt(var + 1e-5) * tp["ln_g"] + tp["ln_b"]
    h = jnp.maximum(jnp.dot(feat.astype(dt), tp["w1"].astype(dt).T,
                            preferred_element_type=f32) + tp["b1"], 0.0)
    h = jnp.maximum(jnp.dot(h.astype(dt), tp["w2"].astype(dt).T,
                            preferred_element_type=f32) + tp["b2"], 0.0)
    o3 = jnp.dot(h.astype(dt), tp["w3"].astype(dt).T,
                 preferred_element_type=f32) + tp["b3"]
    A = o3.shape[-1] // 2
    mu, log_std = o3[:, :A], o3[:, A:]
    log_std = jnp.tanh(log_std)
    log_std = log_std_min + 0.5 * (log_std_max - log_std_min) * (log_std + 1.0)
    std = jnp.exp(log_std)
    pi = mu + noise * std
    log_pi = jnp.sum(-0.5 * noise ** 2 - log_std, axis=-1, keepdims=True)
    log_pi = log_pi - 0.5 * np.log(2.0 * np.pi) * A
    mu_t = jnp.tanh(mu)
    pi_t = jnp.tanh(pi)
    log_pi = log_pi - jnp.sum(jnp.log(jnp.maximum(1.0 - pi_t ** 2, 0.0) + 1e-6),
                              axis=-1, keepdims=True)
    return mu_t, pi_t, log_pi, log_std


# ----------------------------------------------------------------------------
if __name__ == "__main__":
    key = jax.random.PRNGKey(0)
    B, C, H, W = 2, 4, 16, 16
    action_dim = 6
    hidden_dim = 32
    num_layers = 2
    num_filters = 8
    feature_dim = 32
    log_std_min, log_std_max = -10.0, 2.0

    kp_key, ko, kn = jax.random.split(key, 3)
    tparams = init_actor_params_torch(kp_key, (C, H, W), action_dim, hidden_dim,
                                      num_layers, num_filters, feature_dim)

    obs = jax.random.uniform(ko, (B, C, H, W), jnp.float32, 0.0, 255.0)
    # torch.randn_like(mu) equivalent, precomputed and passed into the kernel
    noise = jax.random.normal(kn, (B, action_dim), jnp.float32)

    names = ("mu", "pi", "log_pi", "log_std")

    # ---- f32 matmul path: strict check against the PyTorch-equivalent ref.
    kparams = prepare_params(tparams, (C, H, W), log_std_min, log_std_max,
                             matmul_dtype=jnp.float32)
    fwd = jax.jit(functools.partial(actor_forward, kparams))
    outs = fwd(obs, noise)
    jax.block_until_ready(outs)
    mu, pi, log_pi, log_std = outs
    assert mu.shape == (B, action_dim)
    assert pi.shape == (B, action_dim)
    assert log_pi.shape == (B, 1)
    assert log_std.shape == (B, action_dim)

    refs = ref_actor_forward(tparams, obs, noise, log_std_min, log_std_max,
                             matmul_dtype=jnp.float32)
    for got, ref in zip(outs, refs):
        np.testing.assert_allclose(np.asarray(got), np.asarray(ref),
                                   atol=1e-3, rtol=1e-3)

    # ---- bf16 matmul path (f32 accumulation / LayerNorm / log-prob tail),
    # checked against the cast-point-matched reference at looser tolerances
    # (log_pi is the most sensitive output).
    kparams_bf16 = prepare_params(tparams, (C, H, W), log_std_min, log_std_max,
                                  matmul_dtype=jnp.bfloat16)
    fwd16 = jax.jit(functools.partial(actor_forward, kparams_bf16))
    outs16 = fwd16(obs, noise)
    jax.block_until_ready(outs16)
    refs16 = ref_actor_forward(tparams, obs, noise, log_std_min, log_std_max,
                               matmul_dtype=jnp.bfloat16)
    tols = {"mu": (2e-2, 2e-2), "pi": (2e-2, 2e-2),
            "log_pi": (2e-1, 5e-2), "log_std": (5e-2, 5e-2)}
    for name, got, ref in zip(names, outs16, refs16):
        atol, rtol = tols[name]
        np.testing.assert_allclose(np.asarray(got), np.asarray(ref),
                                   atol=atol, rtol=rtol)

    print("KERNEL_OK")
</pallas_src>

<mosaic_0001>
module attributes {stable_mosaic.version = 11 : i64} {
  func.func @_actor_kernel(%arg0: i32, %arg1: memref<2x16x64xf32, #tpu.memory_space<vmem>>, %arg2: memref<2x1x6xf32, #tpu.memory_space<vmem>>, %arg3: memref<8x64xf32, #tpu.memory_space<vmem>>, %arg4: memref<8x1xf32, #tpu.memory_space<vmem>>, %arg5: memref<1x8x72xf32, #tpu.memory_space<vmem>>, %arg6: memref<1x8x1xf32, #tpu.memory_space<vmem>>, %arg7: memref<8x37x32xf32, #tpu.memory_space<vmem>>, %arg8: memref<1x32xf32, #tpu.memory_space<vmem>>, %arg9: memref<1x32xf32, #tpu.memory_space<vmem>>, %arg10: memref<1x32xf32, #tpu.memory_space<vmem>>, %arg11: memref<32x32xf32, #tpu.memory_space<vmem>>, %arg12: memref<1x32xf32, #tpu.memory_space<vmem>>, %arg13: memref<32x32xf32, #tpu.memory_space<vmem>>, %arg14: memref<1x32xf32, #tpu.memory_space<vmem>>, %arg15: memref<32x12xf32, #tpu.memory_space<vmem>>, %arg16: memref<1x12xf32, #tpu.memory_space<vmem>>, %arg17: memref<2x1x19xf32, #tpu.memory_space<vmem>>) attributes {dimension_semantics = [#tpu.dimension_semantics<parallel>], iteration_bounds = array<i64: 1>, scalar_prefetch = 0 : i64, scratch_operands = 0 : i64, tpu.core_type = #tpu.core_type<tc>, window_params = [{transform_indices = @transform_0, window_bounds = array<i64: 2, 16, 64>}, {transform_indices = @transform_1, window_bounds = array<i64: 2, 1, 6>}, {pipeline_mode = #tpu.pipeline_mode<synchronous>, transform_indices = @transform_2, window_bounds = array<i64: 8, 64>}, {pipeline_mode = #tpu.pipeline_mode<synchronous>, transform_indices = @transform_3, window_bounds = array<i64: 8, 1>}, {pipeline_mode = #tpu.pipeline_mode<synchronous>, transform_indices = @transform_4, window_bounds = array<i64: 1, 8, 72>}, {pipeline_mode = #tpu.pipeline_mode<synchronous>, transform_indices = @transform_5, window_bounds = array<i64: 1, 8, 1>}, {pipeline_mode = #tpu.pipeline_mode<synchronous>, transform_indices = @transform_6, window_bounds = array<i64: 8, 37, 32>}, {pipeline_mode = #tpu.pipeline_mode<synchronous>, transform_indices = @transform_7, window_bounds = array<i64: 1, 32>}, {pipeline_mode = #tpu.pipeline_mode<synchronous>, transform_indices = @transform_8, window_bounds = array<i64: 1, 32>}, {pipeline_mode = #tpu.pipeline_mode<synchronous>, transform_indices = @transform_9, window_bounds = array<i64: 1, 32>}, {pipeline_mode = #tpu.pipeline_mode<synchronous>, transform_indices = @transform_10, window_bounds = array<i64: 32, 32>}, {pipeline_mode = #tpu.pipeline_mode<synchronous>, transform_indices = @transform_11, window_bounds = array<i64: 1, 32>}, {pipeline_mode = #tpu.pipeline_mode<synchronous>, transform_indices = @transform_12, window_bounds = array<i64: 32, 32>}, {pipeline_mode = #tpu.pipeline_mode<synchronous>, transform_indices = @transform_13, window_bounds = array<i64: 1, 32>}, {pipeline_mode = #tpu.pipeline_mode<synchronous>, transform_indices = @transform_14, window_bounds = array<i64: 32, 12>}, {pipeline_mode = #tpu.pipeline_mode<synchronous>, transform_indices = @transform_15, window_bounds = array<i64: 1, 12>}, {transform_indices = @transform_16, window_bounds = array<i64: 2, 1, 19>}]} {
    %c0 = arith.constant 0 : index
    %c0_0 = arith.constant 0 : index
    %c0_1 = arith.constant 0 : index
    %0 = vector.load %arg1[%c0, %c0_0, %c0_1] : memref<2x16x64xf32, #tpu.memory_space<vmem>>, vector<2x16x64xf32>
    %1 = vector.extract_strided_slice %0 {offsets = [0, 0, 0], sizes = [1, 16, 55], strides = [1, 1, 1]} : vector<2x16x64xf32> to vector<1x16x55xf32>
    %2 = vector.shape_cast %1 : vector<1x16x55xf32> to vector<16x55xf32>
    %3 = vector.extract_strided_slice %0 {offsets = [1, 0, 0], sizes = [1, 16, 55], strides = [1, 1, 1]} : vector<2x16x64xf32> to vector<1x16x55xf32>
    %4 = vector.shape_cast %3 : vector<1x16x55xf32> to vector<16x55xf32>
    %5 = tpu.concatenate %2, %4 in 1 : vector<16x55xf32>, vector<16x55xf32> -> vector<16x110xf32>
    %6 = vector.extract_strided_slice %0 {offsets = [0, 0, 1], sizes = [1, 16, 55], strides = [1, 1, 1]} : vector<2x16x64xf32> to vector<1x16x55xf32>
    %7 = vector.shape_cast %6 : vector<1x16x55xf32> to vector<16x55xf32>
    %8 = vector.extract_strided_slice %0 {offsets = [1, 0, 1], sizes = [1, 16, 55], strides = [1, 1, 1]} : vector<2x16x64xf32> to vector<1x16x55xf32>
    %9 = vector.shape_cast %8 : vector<1x16x55xf32> to vector<16x55xf32>
    %10 = tpu.concatenate %7, %9 in 1 : vector<16x55xf32>, vector<16x55xf32> -> vector<16x110xf32>
    %11 = vector.extract_strided_slice %0 {offsets = [0, 0, 8], sizes = [1, 16, 55], strides = [1, 1, 1]} : vector<2x16x64xf32> to vector<1x16x55xf32>
    %12 = vector.shape_cast %11 : vector<1x16x55xf32> to vector<16x55xf32>
    %13 = vector.extract_strided_slice %0 {offsets = [1, 0, 8], sizes = [1, 16, 55], strides = [1, 1, 1]} : vector<2x16x64xf32> to vector<1x16x55xf32>
    %14 = vector.shape_cast %13 : vector<1x16x55xf32> to vector<16x55xf32>
    %15 = tpu.concatenate %12, %14 in 1 : vector<16x55xf32>, vector<16x55xf32> -> vector<16x110xf32>
    %16 = vector.extract_strided_slice %0 {offsets = [0, 0, 9], sizes = [1, 16, 55], strides = [1, 1, 1]} : vector<2x16x64xf32> to vector<1x16x55xf32>
    %17 = vector.shape_cast %16 : vector<1x16x55xf32> to vector<16x55xf32>
    %18 = vector.extract_strided_slice %0 {offsets = [1, 0, 9], sizes = [1, 16, 55], strides = [1, 1, 1]} : vector<2x16x64xf32> to vector<1x16x55xf32>
    %19 = vector.shape_cast %18 : vector<1x16x55xf32> to vector<16x55xf32>
    %20 = tpu.concatenate %17, %19 in 1 : vector<16x55xf32>, vector<16x55xf32> -> vector<16x110xf32>
    %21 = tpu.concatenate %5, %10, %15, %20 in 0 : vector<16x110xf32>, vector<16x110xf32>, vector<16x110xf32>, vector<16x110xf32> -> vector<64x110xf32>
    %c0_2 = arith.constant 0 : index
    %c0_3 = arith.constant 0 : index
    %22 = vector.load %arg3[%c0_2, %c0_3] : memref<8x64xf32, #tpu.memory_space<vmem>>, vector<8x64xf32>
    %cst = arith.constant dense<0.000000e+00> : vector<8x110xf32>
    %23 = tpu.matmul %22, %21, %cst {dimension_numbers = #tpu.dot_dimension_numbers<[1], [0], [0], [1], [0, 0, 1, 1], [], []>} : vector<8x64xf32>, vector<64x110xf32>, vector<8x110xf32> -> vector<8x110xf32>
    %c0_4 = arith.constant 0 : index
    %c0_5 = arith.constant 0 : index
    %24 = vector.load %arg4[%c0_4, %c0_5] : memref<8x1xf32, #tpu.memory_space<vmem>>, vector<8x1xf32>
    %25 = vector.broadcast %24 : vector<8x1xf32> to vector<8x110xf32>
    %26 = arith.addf %23, %25 : vector<8x110xf32>
    %cst_6 = arith.constant 0.000000e+00 : f32
    %27 = vector.broadcast %cst_6 : f32 to vector<8x110xf32>
    %28 = arith.maximumf %26, %27 : vector<8x110xf32>
    %29 = vector.extract_strided_slice %28 {offsets = [0, 0], sizes = [8, 37], strides = [1, 1]} : vector<8x110xf32> to vector<8x37xf32>
    %30 = vector.extract_strided_slice %28 {offsets = [0, 55], sizes = [8, 37], strides = [1, 1]} : vector<8x110xf32> to vector<8x37xf32>
    %31 = tpu.concatenate %29, %30 in 1 : vector<8x37xf32>, vector<8x37xf32> -> vector<8x74xf32>
    %32 = vector.extract_strided_slice %28 {offsets = [0, 1], sizes = [8, 37], strides = [1, 1]} : vector<8x110xf32> to vector<8x37xf32>
    %33 = vector.extract_strided_slice %28 {offsets = [0, 56], sizes = [8, 37], strides = [1, 1]} : vector<8x110xf32> to vector<8x37xf32>
    %34 = tpu.concatenate %32, %33 in 1 : vector<8x37xf32>, vector<8x37xf32> -> vector<8x74xf32>
    %35 = vector.extract_strided_slice %28 {offsets = [0, 2], sizes = [8, 37], strides = [1, 1]} : vector<8x110xf32> to vector<8x37xf32>
    %36 = vector.extract_strided_slice %28 {offsets = [0, 57], sizes = [8, 37], strides = [1, 1]} : vector<8x110xf32> to vector<8x37xf32>
    %37 = tpu.concatenate %35, %36 in 1 : vector<8x37xf32>, vector<8x37xf32> -> vector<8x74xf32>
    %38 = vector.extract_strided_slice %28 {offsets = [0, 8], sizes = [8, 37], strides = [1, 1]} : vector<8x110xf32> to vector<8x37xf32>
    %39 = vector.extract_strided_slice %28 {offsets = [0, 63], sizes = [8, 37], strides = [1, 1]} : vector<8x110xf32> to vector<8x37xf32>
    %40 = tpu.concatenate %38, %39 in 1 : vector<8x37xf32>, vector<8x37xf32> -> vector<8x74xf32>
    %41 = vector.extract_strided_slice %28 {offsets = [0, 9], sizes = [8, 37], strides = [1, 1]} : vector<8x110xf32> to vector<8x37xf32>
    %42 = vector.extract_strided_slice %28 {offsets = [0, 64], sizes = [8, 37], strides = [1, 1]} : vector<8x110xf32> to vector<8x37xf32>
    %43 = tpu.concatenate %41, %42 in 1 : vector<8x37xf32>, vector<8x37xf32> -> vector<8x74xf32>
    %44 = vector.extract_strided_slice %28 {offsets = [0, 10], sizes = [8, 37], strides = [1, 1]} : vector<8x110xf32> to vector<8x37xf32>
    %45 = vector.extract_strided_slice %28 {offsets = [0, 65], sizes = [8, 37], strides = [1, 1]} : vector<8x110xf32> to vector<8x37xf32>
    %46 = tpu.concatenate %44, %45 in 1 : vector<8x37xf32>, vector<8x37xf32> -> vector<8x74xf32>
    %47 = vector.extract_strided_slice %28 {offsets = [0, 16], sizes = [8, 37], strides = [1, 1]} : vector<8x110xf32> to vector<8x37xf32>
    %48 = vector.extract_strided_slice %28 {offsets = [0, 71], sizes = [8, 37], strides = [1, 1]} : vector<8x110xf32> to vector<8x37xf32>
    %49 = tpu.concatenate %47, %48 in 1 : vector<8x37xf32>, vector<8x37xf32> -> vector<8x74xf32>
    %50 = vector.extract_strided_slice %28 {offsets = [0, 17], sizes = [8, 37], strides = [1, 1]} : vector<8x110xf32> to vector<8x37xf32>
    %51 = vector.extract_strided_slice %28 {offsets = [0, 72], sizes = [8, 37], strides = [1, 1]} : vector<8x110xf32> to vector<8x37xf32>
    %52 = tpu.concatenate %50, %51 in 1 : vector<8x37xf32>, vector<8x37xf32> -> vector<8x74xf32>
    %53 = vector.extract_strided_slice %28 {offsets = [0, 18], sizes = [8, 37], strides = [1, 1]} : vector<8x110xf32> to vector<8x37xf32>
    %54 = vector.extract_strided_slice %28 {offsets = [0, 73], sizes = [8, 37], strides = [1, 1]} : vector<8x110xf32> to vector<8x37xf32>
    %55 = tpu.concatenate %53, %54 in 1 : vector<8x37xf32>, vector<8x37xf32> -> vector<8x74xf32>
    %56 = tpu.concatenate %31, %34, %37, %40, %43, %46, %49, %52, %55 in 0 : vector<8x74xf32>, vector<8x74xf32>, vector<8x74xf32>, vector<8x74xf32>, vector<8x74xf32>, vector<8x74xf32>, vector<8x74xf32>, vector<8x74xf32>, vector<8x74xf32> -> vector<72x74xf32>
    %c0_7 = arith.constant 0 : index
    %c0_8 = arith.constant 0 : index
    %c0_9 = arith.constant 0 : index
    %57 = vector.load %arg5[%c0_7, %c0_8, %c0_9] : memref<1x8x72xf32, #tpu.memory_space<vmem>>, vector<1x8x72xf32>
    %58 = vector.shape_cast %57 : vector<1x8x72xf32> to vector<8x72xf32>
    %cst_10 = arith.constant dense<0.000000e+00> : vector<8x74xf32>
    %59 = tpu.matmul %58, %56, %cst_10 {dimension_numbers = #tpu.dot_dimension_numbers<[1], [0], [0], [1], [0, 0, 1, 1], [], []>} : vector<8x72xf32>, vector<72x74xf32>, vector<8x74xf32> -> vector<8x74xf32>
    %c0_11 = arith.constant 0 : index
    %c0_12 = arith.constant 0 : index
    %c0_13 = arith.constant 0 : index
    %60 = vector.load %arg6[%c0_11, %c0_12, %c0_13] : memref<1x8x1xf32, #tpu.memory_space<vmem>>, vector<1x8x1xf32>
    %61 = vector.shape_cast %60 : vector<1x8x1xf32> to vector<8x1xf32>
    %62 = vector.broadcast %61 : vector<8x1xf32> to vector<8x74xf32>
    %63 = arith.addf %59, %62 : vector<8x74xf32>
    %cst_14 = arith.constant 0.000000e+00 : f32
    %64 = vector.broadcast %cst_14 : f32 to vector<8x74xf32>
    %65 = arith.maximumf %63, %64 : vector<8x74xf32>
    %66 = vector.extract_strided_slice %65 {offsets = [0, 0], sizes = [1, 37], strides = [1, 1]} : vector<8x74xf32> to vector<1x37xf32>
    %67 = vector.extract_strided_slice %65 {offsets = [0, 37], sizes = [1, 37], strides = [1, 1]} : vector<8x74xf32> to vector<1x37xf32>
    %68 = tpu.concatenate %66, %67 in 0 : vector<1x37xf32>, vector<1x37xf32> -> vector<2x37xf32>
    %c0_15 = arith.constant 0 : index
    %c0_16 = arith.constant 0 : index
    %c0_17 = arith.constant 0 : index
    %69 = vector.load %arg7[%c0_15, %c0_16, %c0_17] : memref<8x37x32xf32, #tpu.memory_space<vmem>>, vector<1x37x32xf32>
    %70 = vector.shape_cast %69 : vector<1x37x32xf32> to vector<37x32xf32>
    %cst_18 = arith.constant dense<0.000000e+00> : vector<2x32xf32>
    %71 = tpu.matmul %68, %70, %cst_18 {dimension_numbers = #tpu.dot_dimension_numbers<[1], [0], [0], [1], [0, 0, 1, 1], [], []>} : vector<2x37xf32>, vector<37x32xf32>, vector<2x32xf32> -> vector<2x32xf32>
    %72 = vector.extract_strided_slice %65 {offsets = [1, 0], sizes = [1, 37], strides = [1, 1]} : vector<8x74xf32> to vector<1x37xf32>
    %73 = vector.extract_strided_slice %65 {offsets = [1, 37], sizes = [1, 37], strides = [1, 1]} : vector<8x74xf32> to vector<1x37xf32>
    %74 = tpu.concatenate %72, %73 in 0 : vector<1x37xf32>, vector<1x37xf32> -> vector<2x37xf32>
    %c1 = arith.constant 1 : index
    %c0_19 = arith.constant 0 : index
    %c0_20 = arith.constant 0 : index
    %75 = vector.load %arg7[%c1, %c0_19, %c0_20] : memref<8x37x32xf32, #tpu.memory_space<vmem>>, vector<1x37x32xf32>
    %76 = vector.shape_cast %75 : vector<1x37x32xf32> to vector<37x32xf32>
    %cst_21 = arith.constant dense<0.000000e+00> : vector<2x32xf32>
    %77 = tpu.matmul %74, %76, %cst_21 {dimension_numbers = #tpu.dot_dimension_numbers<[1], [0], [0], [1], [0, 0, 1, 1], [], []>} : vector<2x37xf32>, vector<37x32xf32>, vector<2x32xf32> -> vector<2x32xf32>
    %78 = vector.extract_strided_slice %65 {offsets = [2, 0], sizes = [1, 37], strides = [1, 1]} : vector<8x74xf32> to vector<1x37xf32>
    %79 = vector.extract_strided_slice %65 {offsets = [2, 37], sizes = [1, 37], strides = [1, 1]} : vector<8x74xf32> to vector<1x37xf32>
    %80 = tpu.concatenate %78, %79 in 0 : vector<1x37xf32>, vector<1x37xf32> -> vector<2x37xf32>
    %c2 = arith.constant 2 : index
    %c0_22 = arith.constant 0 : index
    %c0_23 = arith.constant 0 : index
    %81 = vector.load %arg7[%c2, %c0_22, %c0_23] : memref<8x37x32xf32, #tpu.memory_space<vmem>>, vector<1x37x32xf32>
    %82 = vector.shape_cast %81 : vector<1x37x32xf32> to vector<37x32xf32>
    %cst_24 = arith.constant dense<0.000000e+00> : vector<2x32xf32>
    %83 = tpu.matmul %80, %82, %cst_24 {dimension_numbers = #tpu.dot_dimension_numbers<[1], [0], [0], [1], [0, 0, 1, 1], [], []>} : vector<2x37xf32>, vector<37x32xf32>, vector<2x32xf32> -> vector<2x32xf32>
    %84 = vector.extract_strided_slice %65 {offsets = [3, 0], sizes = [1, 37], strides = [1, 1]} : vector<8x74xf32> to vector<1x37xf32>
    %85 = vector.extract_strided_slice %65 {offsets = [3, 37], sizes = [1, 37], strides = [1, 1]} : vector<8x74xf32> to vector<1x37xf32>
    %86 = tpu.concatenate %84, %85 in 0 : vector<1x37xf32>, vector<1x37xf32> -> vector<2x37xf32>
    %c3 = arith.constant 3 : index
    %c0_25 = arith.constant 0 : index
    %c0_26 = arith.constant 0 : index
    %87 = vector.load %arg7[%c3, %c0_25, %c0_26] : memref<8x37x32xf32, #tpu.memory_space<vmem>>, vector<1x37x32xf32>
    %88 = vector.shape_cast %87 : vector<1x37x32xf32> to vector<37x32xf32>
    %cst_27 = arith.constant dense<0.000000e+00> : vector<2x32xf32>
    %89 = tpu.matmul %86, %88, %cst_27 {dimension_numbers = #tpu.dot_dimension_numbers<[1], [0], [0], [1], [0, 0, 1, 1], [], []>} : vector<2x37xf32>, vector<37x32xf32>, vector<2x32xf32> -> vector<2x32xf32>
    %90 = vector.extract_strided_slice %65 {offsets = [4, 0], sizes = [1, 37], strides = [1, 1]} : vector<8x74xf32> to vector<1x37xf32>
    %91 = vector.extract_strided_slice %65 {offsets = [4, 37], sizes = [1, 37], strides = [1, 1]} : vector<8x74xf32> to vector<1x37xf32>
    %92 = tpu.concatenate %90, %91 in 0 : vector<1x37xf32>, vector<1x37xf32> -> vector<2x37xf32>
    %c4 = arith.constant 4 : index
    %c0_28 = arith.constant 0 : index
    %c0_29 = arith.constant 0 : index
    %93 = vector.load %arg7[%c4, %c0_28, %c0_29] : memref<8x37x32xf32, #tpu.memory_space<vmem>>, vector<1x37x32xf32>
    %94 = vector.shape_cast %93 : vector<1x37x32xf32> to vector<37x32xf32>
    %cst_30 = arith.constant dense<0.000000e+00> : vector<2x32xf32>
    %95 = tpu.matmul %92, %94, %cst_30 {dimension_numbers = #tpu.dot_dimension_numbers<[1], [0], [0], [1], [0, 0, 1, 1], [], []>} : vector<2x37xf32>, vector<37x32xf32>, vector<2x32xf32> -> vector<2x32xf32>
    %96 = vector.extract_strided_slice %65 {offsets = [5, 0], sizes = [1, 37], strides = [1, 1]} : vector<8x74xf32> to vector<1x37xf32>
    %97 = vector.extract_strided_slice %65 {offsets = [5, 37], sizes = [1, 37], strides = [1, 1]} : vector<8x74xf32> to vector<1x37xf32>
    %98 = tpu.concatenate %96, %97 in 0 : vector<1x37xf32>, vector<1x37xf32> -> vector<2x37xf32>
    %c5 = arith.constant 5 : index
    %c0_31 = arith.constant 0 : index
    %c0_32 = arith.constant 0 : index
    %99 = vector.load %arg7[%c5, %c0_31, %c0_32] : memref<8x37x32xf32, #tpu.memory_space<vmem>>, vector<1x37x32xf32>
    %100 = vector.shape_cast %99 : vector<1x37x32xf32> to vector<37x32xf32>
    %cst_33 = arith.constant dense<0.000000e+00> : vector<2x32xf32>
    %101 = tpu.matmul %98, %100, %cst_33 {dimension_numbers = #tpu.dot_dimension_numbers<[1], [0], [0], [1], [0, 0, 1, 1], [], []>} : vector<2x37xf32>, vector<37x32xf32>, vector<2x32xf32> -> vector<2x32xf32>
    %102 = vector.extract_strided_slice %65 {offsets = [6, 0], sizes = [1, 37], strides = [1, 1]} : vector<8x74xf32> to vector<1x37xf32>
    %103 = vector.extract_strided_slice %65 {offsets = [6, 37], sizes = [1, 37], strides = [1, 1]} : vector<8x74xf32> to vector<1x37xf32>
    %104 = tpu.concatenate %102, %103 in 0 : vector<1x37xf32>, vector<1x37xf32> -> vector<2x37xf32>
    %c6 = arith.constant 6 : index
    %c0_34 = arith.constant 0 : index
    %c0_35 = arith.constant 0 : index
    %105 = vector.load %arg7[%c6, %c0_34, %c0_35] : memref<8x37x32xf32, #tpu.memory_space<vmem>>, vector<1x37x32xf32>
    %106 = vector.shape_cast %105 : vector<1x37x32xf32> to vector<37x32xf32>
    %cst_36 = arith.constant dense<0.000000e+00> : vector<2x32xf32>
    %107 = tpu.matmul %104, %106, %cst_36 {dimension_numbers = #tpu.dot_dimension_numbers<[1], [0], [0], [1], [0, 0, 1, 1], [], []>} : vector<2x37xf32>, vector<37x32xf32>, vector<2x32xf32> -> vector<2x32xf32>
    %108 = vector.extract_strided_slice %65 {offsets = [7, 0], sizes = [1, 37], strides = [1, 1]} : vector<8x74xf32> to vector<1x37xf32>
    %109 = vector.extract_strided_slice %65 {offsets = [7, 37], sizes = [1, 37], strides = [1, 1]} : vector<8x74xf32> to vector<1x37xf32>
    %110 = tpu.concatenate %108, %109 in 0 : vector<1x37xf32>, vector<1x37xf32> -> vector<2x37xf32>
    %c7 = arith.constant 7 : index
    %c0_37 = arith.constant 0 : index
    %c0_38 = arith.constant 0 : index
    %111 = vector.load %arg7[%c7, %c0_37, %c0_38] : memref<8x37x32xf32, #tpu.memory_space<vmem>>, vector<1x37x32xf32>
    %112 = vector.shape_cast %111 : vector<1x37x32xf32> to vector<37x32xf32>
    %cst_39 = arith.constant dense<0.000000e+00> : vector<2x32xf32>
    %113 = tpu.matmul %110, %112, %cst_39 {dimension_numbers = #tpu.dot_dimension_numbers<[1], [0], [0], [1], [0, 0, 1, 1], [], []>} : vector<2x37xf32>, vector<37x32xf32>, vector<2x32xf32> -> vector<2x32xf32>
    %114 = arith.addf %71, %77 : vector<2x32xf32>
    %115 = arith.addf %83, %89 : vector<2x32xf32>
    %116 = arith.addf %95, %101 : vector<2x32xf32>
    %117 = arith.addf %107, %113 : vector<2x32xf32>
    %118 = arith.addf %114, %115 : vector<2x32xf32>
    %119 = arith.addf %116, %117 : vector<2x32xf32>
    %120 = arith.addf %118, %119 : vector<2x32xf32>
    %c0_40 = arith.constant 0 : index
    %c0_41 = arith.constant 0 : index
    %121 = vector.load %arg8[%c0_40, %c0_41] : memref<1x32xf32, #tpu.memory_space<vmem>>, vector<1x32xf32>
    %122 = vector.broadcast %121 : vector<1x32xf32> to vector<2x32xf32>
    %123 = arith.addf %120, %122 : vector<2x32xf32>
    %cst_42 = arith.constant dense<0.000000e+00> : vector<2xf32>
    %124 = vector.multi_reduction <add>, %123, %cst_42 [1] : vector<2x32xf32> to vector<2xf32>
    %125 = vector.shape_cast %124 : vector<2xf32> to vector<2x1xf32>
    %cst_43 = arith.constant 3.200000e+01 : f32
    %126 = vector.broadcast %cst_43 : f32 to vector<2x1xf32>
    %127 = arith.divf %125, %126 : vector<2x1xf32>
    %128 = vector.broadcast %127 : vector<2x1xf32> to vector<2x32xf32>
    %129 = arith.subf %123, %128 : vector<2x32xf32>
    %130 = arith.mulf %129, %129 : vector<2x32xf32>
    %cst_44 = arith.constant dense<0.000000e+00> : vector<2xf32>
    %131 = vector.multi_reduction <add>, %130, %cst_44 [1] : vector<2x32xf32> to vector<2xf32>
    %132 = vector.shape_cast %131 : vector<2xf32> to vector<2x1xf32>
    %cst_45 = arith.constant 3.200000e+01 : f32
    %133 = vector.broadcast %cst_45 : f32 to vector<2x1xf32>
    %134 = arith.divf %132, %133 : vector<2x1xf32>
    %135 = vector.broadcast %127 : vector<2x1xf32> to vector<2x32xf32>
    %136 = arith.subf %123, %135 : vector<2x32xf32>
    %cst_46 = arith.constant 9.99999974E-6 : f32
    %137 = vector.broadcast %cst_46 : f32 to vector<2x1xf32>
    %138 = arith.addf %134, %137 : vector<2x1xf32>
    %139 = math.rsqrt %138 : vector<2x1xf32>
    %140 = vector.broadcast %139 : vector<2x1xf32> to vector<2x32xf32>
    %141 = arith.mulf %136, %140 : vector<2x32xf32>
    %c0_47 = arith.constant 0 : index
    %c0_48 = arith.constant 0 : index
    %142 = vector.load %arg9[%c0_47, %c0_48] : memref<1x32xf32, #tpu.memory_space<vmem>>, vector<1x32xf32>
    %143 = vector.broadcast %142 : vector<1x32xf32> to vector<2x32xf32>
    %144 = arith.mulf %141, %143 : vector<2x32xf32>
    %c0_49 = arith.constant 0 : index
    %c0_50 = arith.constant 0 : index
    %145 = vector.load %arg10[%c0_49, %c0_50] : memref<1x32xf32, #tpu.memory_space<vmem>>, vector<1x32xf32>
    %146 = vector.broadcast %145 : vector<1x32xf32> to vector<2x32xf32>
    %147 = arith.addf %144, %146 : vector<2x32xf32>
    %c0_51 = arith.constant 0 : index
    %c0_52 = arith.constant 0 : index
    %148 = vector.load %arg11[%c0_51, %c0_52] : memref<32x32xf32, #tpu.memory_space<vmem>>, vector<32x32xf32>
    %cst_53 = arith.constant dense<0.000000e+00> : vector<2x32xf32>
    %149 = tpu.matmul %147, %148, %cst_53 {dimension_numbers = #tpu.dot_dimension_numbers<[1], [0], [0], [1], [0, 0, 1, 1], [], []>} : vector<2x32xf32>, vector<32x32xf32>, vector<2x32xf32> -> vector<2x32xf32>
    %c0_54 = arith.constant 0 : index
    %c0_55 = arith.constant 0 : index
    %150 = vector.load %arg12[%c0_54, %c0_55] : memref<1x32xf32, #tpu.memory_space<vmem>>, vector<1x32xf32>
    %151 = vector.broadcast %150 : vector<1x32xf32> to vector<2x32xf32>
    %152 = arith.addf %149, %151 : vector<2x32xf32>
    %cst_56 = arith.constant 0.000000e+00 : f32
    %153 = vector.broadcast %cst_56 : f32 to vector<2x32xf32>
    %154 = arith.maximumf %152, %153 : vector<2x32xf32>
    %c0_57 = arith.constant 0 : index
    %c0_58 = arith.constant 0 : index
    %155 = vector.load %arg13[%c0_57, %c0_58] : memref<32x32xf32, #tpu.memory_space<vmem>>, vector<32x32xf32>
    %cst_59 = arith.constant dense<0.000000e+00> : vector<2x32xf32>
    %156 = tpu.matmul %154, %155, %cst_59 {dimension_numbers = #tpu.dot_dimension_numbers<[1], [0], [0], [1], [0, 0, 1, 1], [], []>} : vector<2x32xf32>, vector<32x32xf32>, vector<2x32xf32> -> vector<2x32xf32>
    %c0_60 = arith.constant 0 : index
    %c0_61 = arith.constant 0 : index
    %157 = vector.load %arg14[%c0_60, %c0_61] : memref<1x32xf32, #tpu.memory_space<vmem>>, vector<1x32xf32>
    %158 = vector.broadcast %157 : vector<1x32xf32> to vector<2x32xf32>
    %159 = arith.addf %156, %158 : vector<2x32xf32>
    %cst_62 = arith.constant 0.000000e+00 : f32
    %160 = vector.broadcast %cst_62 : f32 to vector<2x32xf32>
    %161 = arith.maximumf %159, %160 : vector<2x32xf32>
    %c0_63 = arith.constant 0 : index
    %c0_64 = arith.constant 0 : index
    %162 = vector.load %arg15[%c0_63, %c0_64] : memref<32x12xf32, #tpu.memory_space<vmem>>, vector<32x12xf32>
    %cst_65 = arith.constant dense<0.000000e+00> : vector<2x12xf32>
    %163 = tpu.matmul %161, %162, %cst_65 {dimension_numbers = #tpu.dot_dimension_numbers<[1], [0], [0], [1], [0, 0, 1, 1], [], []>} : vector<2x32xf32>, vector<32x12xf32>, vector<2x12xf32> -> vector<2x12xf32>
    %c0_66 = arith.constant 0 : index
    %c0_67 = arith.constant 0 : index
    %164 = vector.load %arg16[%c0_66, %c0_67] : memref<1x12xf32, #tpu.memory_space<vmem>>, vector<1x12xf32>
    %165 = vector.broadcast %164 : vector<1x12xf32> to vector<2x12xf32>
    %166 = arith.addf %163, %165 : vector<2x12xf32>
    %167 = vector.extract_strided_slice %166 {offsets = [0, 0], sizes = [2, 6], strides = [1, 1]} : vector<2x12xf32> to vector<2x6xf32>
    %168 = vector.extract_strided_slice %166 {offsets = [0, 6], sizes = [2, 6], strides = [1, 1]} : vector<2x12xf32> to vector<2x6xf32>
    %169 = math.tanh %168 : vector<2x6xf32>
    %cst_68 = arith.constant 1.000000e+00 : f32
    %170 = vector.broadcast %cst_68 : f32 to vector<2x6xf32>
    %171 = arith.addf %169, %170 : vector<2x6xf32>
    %cst_69 = arith.constant 6.000000e+00 : f32
    %172 = vector.broadcast %cst_69 : f32 to vector<2x6xf32>
    %173 = arith.mulf %172, %171 : vector<2x6xf32>
    %cst_70 = arith.constant -1.000000e+01 : f32
    %174 = vector.broadcast %cst_70 : f32 to vector<2x6xf32>
    %175 = arith.addf %174, %173 : vector<2x6xf32>
    %176 = math.exp %175 : vector<2x6xf32>
    %c0_71 = arith.constant 0 : index
    %c0_72 = arith.constant 0 : index
    %c0_73 = arith.constant 0 : index
    %177 = vector.load %arg2[%c0_71, %c0_72, %c0_73] : memref<2x1x6xf32, #tpu.memory_space<vmem>>, vector<2x1x6xf32>
    %178 = vector.shape_cast %177 : vector<2x1x6xf32> to vector<2x6xf32>
    %179 = arith.mulf %178, %176 : vector<2x6xf32>
    %180 = arith.addf %167, %179 : vector<2x6xf32>
    %cst_74 = arith.constant -5.000000e-01 : f32
    %181 = vector.broadcast %cst_74 : f32 to vector<2x6xf32>
    %182 = arith.mulf %181, %178 : vector<2x6xf32>
    %183 = arith.mulf %182, %178 : vector<2x6xf32>
    %184 = arith.subf %183, %175 : vector<2x6xf32>
    %cst_75 = arith.constant dense<0.000000e+00> : vector<2xf32>
    %185 = vector.multi_reduction <add>, %184, %cst_75 [1] : vector<2x6xf32> to vector<2xf32>
    %186 = vector.shape_cast %185 : vector<2xf32> to vector<2x1xf32>
    %cst_76 = arith.constant 5.51363134 : f32
    %187 = vector.broadcast %cst_76 : f32 to vector<2x1xf32>
    %188 = arith.subf %186, %187 : vector<2x1xf32>
    %189 = math.tanh %167 : vector<2x6xf32>
    %190 = math.tanh %180 : vector<2x6xf32>
    %191 = arith.mulf %190, %190 : vector<2x6xf32>
    %cst_77 = arith.constant 1.000000e+00 : f32
    %192 = vector.broadcast %cst_77 : f32 to vector<2x6xf32>
    %193 = arith.subf %192, %191 : vector<2x6xf32>
    %cst_78 = arith.constant 0.000000e+00 : f32
    %194 = vector.broadcast %cst_78 : f32 to vector<2x6xf32>
    %195 = arith.maximumf %193, %194 : vector<2x6xf32>
    %cst_79 = arith.constant 9.99999997E-7 : f32
    %196 = vector.broadcast %cst_79 : f32 to vector<2x6xf32>
    %197 = arith.addf %195, %196 : vector<2x6xf32>
    %198 = math.log %197 : vector<2x6xf32>
    %cst_80 = arith.constant dense<0.000000e+00> : vector<2xf32>
    %199 = vector.multi_reduction <add>, %198, %cst_80 [1] : vector<2x6xf32> to vector<2xf32>
    %200 = vector.shape_cast %199 : vector<2xf32> to vector<2x1xf32>
    %201 = arith.subf %188, %200 : vector<2x1xf32>
    %202 = tpu.concatenate %189, %190, %175, %201 in 1 : vector<2x6xf32>, vector<2x6xf32>, vector<2x6xf32>, vector<2x1xf32> -> vector<2x19xf32>
    %c0_81 = arith.constant 0 : index
    %c0_82 = arith.constant 0 : index
    %c0_83 = arith.constant 0 : index
    %203 = vector.load %arg17[%c0_81, %c0_82, %c0_83] : memref<2x1x19xf32, #tpu.memory_space<vmem>>, vector<2x1x19xf32>
    %204 = vector.shape_cast %203 : vector<2x1x19xf32> to vector<2x19xf32>
    %205 = vector.shape_cast %202 : vector<2x19xf32> to vector<2x1x19xf32>
    tpu.vector_store %arg17[%c0_81, %c0_82, %c0_83], %205 {strides = array<i32>} : memref<2x1x19xf32, #tpu.memory_space<vmem>>, vector<2x1x19xf32>,
    return
  }
  func.func @transform_0(%arg0: i32) -> (i32, i32, i32) {
    %c0_i32 = arith.constant 0 : i32
    %c0_i32_0 = arith.constant 0 : i32
    %c0_i32_1 = arith.constant 0 : i32
    return %arg0, %c0_i32, %c0_i32_0 : i32, i32, i32
  }
  func.func @transform_1(%arg0: i32) -> (i32, i32, i32) {
    %c0_i32 = arith.constant 0 : i32
    %c0_i32_0 = arith.constant 0 : i32
    %c0_i32_1 = arith.constant 0 : i32
    return %arg0, %c0_i32, %c0_i32_0 : i32, i32, i32
  }
  func.func @transform_2(%arg0: i32) -> (i32, i32) {
    %c0_i32 = arith.constant 0 : i32
    %c0_i32_0 = arith.constant 0 : i32
    %c0_i32_1 = arith.constant 0 : i32
    return %c0_i32, %c0_i32_0 : i32, i32
  }
  func.func @transform_3(%arg0: i32) -> (i32, i32) {
    %c0_i32 = arith.constant 0 : i32
    %c0_i32_0 = arith.constant 0 : i32
    %c0_i32_1 = arith.constant 0 : i32
    return %c0_i32, %c0_i32_0 : i32, i32
  }
  func.func @transform_4(%arg0: i32) -> (i32, i32, i32) {
    %c0_i32 = arith.constant 0 : i32
    %c0_i32_0 = arith.constant 0 : i32
    %c0_i32_1 = arith.constant 0 : i32
    %c0_i32_2 = arith.constant 0 : i32
    return %c0_i32, %c0_i32_0, %c0_i32_1 : i32, i32, i32
  }
  func.func @transform_5(%arg0: i32) -> (i32, i32, i32) {
    %c0_i32 = arith.constant 0 : i32
    %c0_i32_0 = arith.constant 0 : i32
    %c0_i32_1 = arith.constant 0 : i32
    %c0_i32_2 = arith.constant 0 : i32
    return %c0_i32, %c0_i32_0, %c0_i32_1 : i32, i32, i32
  }
  func.func @transform_6(%arg0: i32) -> (i32, i32, i32) {
    %c0_i32 = arith.constant 0 : i32
    %c0_i32_0 = arith.constant 0 : i32
    %c0_i32_1 = arith.constant 0 : i32
    %c0_i32_2 = arith.constant 0 : i32
    return %c0_i32, %c0_i32_0, %c0_i32_1 : i32, i32, i32
  }
  func.func @transform_7(%arg0: i32) -> (i32, i32) {
    %c0_i32 = arith.constant 0 : i32
    %c0_i32_0 = arith.constant 0 : i32
    %c0_i32_1 = arith.constant 0 : i32
    return %c0_i32, %c0_i32_0 : i32, i32
  }
  func.func @transform_8(%arg0: i32) -> (i32, i32) {
    %c0_i32 = arith.constant 0 : i32
    %c0_i32_0 = arith.constant 0 : i32
    %c0_i32_1 = arith.constant 0 : i32
    return %c0_i32, %c0_i32_0 : i32, i32
  }
  func.func @transform_9(%arg0: i32) -> (i32, i32) {
    %c0_i32 = arith.constant 0 : i32
    %c0_i32_0 = arith.constant 0 : i32
    %c0_i32_1 = arith.constant 0 : i32
    return %c0_i32, %c0_i32_0 : i32, i32
  }
  func.func @transform_10(%arg0: i32) -> (i32, i32) {
    %c0_i32 = arith.constant 0 : i32
    %c0_i32_0 = arith.constant 0 : i32
    %c0_i32_1 = arith.constant 0 : i32
    return %c0_i32, %c0_i32_0 : i32, i32
  }
  func.func @transform_11(%arg0: i32) -> (i32, i32) {
    %c0_i32 = arith.constant 0 : i32
    %c0_i32_0 = arith.constant 0 : i32
    %c0_i32_1 = arith.constant 0 : i32
    return %c0_i32, %c0_i32_0 : i32, i32
  }
  func.func @transform_12(%arg0: i32) -> (i32, i32) {
    %c0_i32 = arith.constant 0 : i32
    %c0_i32_0 = arith.constant 0 : i32
    %c0_i32_1 = arith.constant 0 : i32
    return %c0_i32, %c0_i32_0 : i32, i32
  }
  func.func @transform_13(%arg0: i32) -> (i32, i32) {
    %c0_i32 = arith.constant 0 : i32
    %c0_i32_0 = arith.constant 0 : i32
    %c0_i32_1 = arith.constant 0 : i32
    return %c0_i32, %c0_i32_0 : i32, i32
  }
  func.func @transform_14(%arg0: i32) -> (i32, i32) {
    %c0_i32 = arith.constant 0 : i32
    %c0_i32_0 = arith.constant 0 : i32
    %c0_i32_1 = arith.constant 0 : i32
    return %c0_i32, %c0_i32_0 : i32, i32
  }
  func.func @transform_15(%arg0: i32) -> (i32, i32) {
    %c0_i32 = arith.constant 0 : i32
    %c0_i32_0 = arith.constant 0 : i32
    %c0_i32_1 = arith.constant 0 : i32
    return %c0_i32, %c0_i32_0 : i32, i32
  }
  func.func @transform_16(%arg0: i32) -> (i32, i32, i32) {
    %c0_i32 = arith.constant 0 : i32
    %c0_i32_0 = arith.constant 0 : i32
    %c0_i32_1 = arith.constant 0 : i32
    return %arg0, %c0_i32, %c0_i32_0 : i32, i32, i32
  }
}

</mosaic_0001>

<bundles_post_ra>
// kernel: actor_forward.1
= control target key start
LH: loop header
LB: loop body
LE: loop exit
PB: predicated region body
PF: predicated region fallthrough
CT: control target
= control target key end

     0   :  { %v1868_v2 = vmov 0.0   ;;  %s1869_s26 = smov 119   ;;  %s1871_s17 = smov 120   ;;  %vm1873_vm0 = vmmov 0   ;;  %v1876_v5 = vmov 0   ;;  %vm65_vm1 = vcmask 449536   ;;  %s2411_s0 = inlined_call_operand.vmem [shape: f32[2,16,64], index: 0, kind: input, shape index: {}]   ;;  %s2412_s3 = inlined_call_operand.vmem [shape: f32[8,1], index: 3, kind: input, shape index: {}]   ;;  %s2413_s2 = inlined_call_operand.vmem [shape: f32[8,64], index: 2, kind: input, shape index: {}]   ;;  %s2414_s5 = inlined_call_operand.vmem [shape: f32[1,8,1], index: 5, kind: input, shape index: {}]   ;;  %s2415_s4 = inlined_call_operand.vmem [shape: f32[1,8,72], index: 4, kind: input, shape index: {}]   ;;  %s2416_s6 = inlined_call_operand.vmem [shape: f32[8,37,32], index: 6, kind: input, shape index: {}]   ;;  %s2417_s7 = inlined_call_operand.vmem [shape: f32[1,32], index: 7, kind: input, shape index: {}, may-alias: {7,9,11,13}]   ;;  %s2418_s10 = inlined_call_operand.vmem [shape: f32[32,32], index: 10, kind: input, shape index: {}]   ;;  %s2419_s12 = inlined_call_operand.vmem [shape: f32[32,32], index: 12, kind: input, shape index: {}]   ;;  %s2420_s8 = inlined_call_operand.vmem [shape: f32[1,32], index: 8, kind: input, shape index: {}]   ;;  %s2421_s9 = inlined_call_operand.vmem [shape: f32[1,32], index: 9, kind: input, shape index: {}, may-alias: {7,9,11,13}]   ;;  %s2422_s14 = inlined_call_operand.vmem [shape: f32[32,12], index: 14, kind: input, shape index: {}]   ;;  %s2423_s11 = inlined_call_operand.vmem [shape: f32[1,32], index: 11, kind: input, shape index: {}, may-alias: {7,9,11,13}]   ;;  %s2424_s13 = inlined_call_operand.vmem [shape: f32[1,32], index: 13, kind: input, shape index: {}, may-alias: {7,9,11,13}]   ;;  %s2425_s15 = inlined_call_operand.vmem [shape: f32[1,12], index: 15, kind: input, shape index: {}]   ;;  %s2426_s1 = inlined_call_operand.vmem [shape: f32[2,1,6], index: 1, kind: input, shape index: {}]   ;;  %s2427_s16 = inlined_call_operand.vmem [shape: f32[2,1,19], index: 16, kind: output, shape index: {}]  }
   0x1   :  { %2429 = sst [smem:[#allocation2_spill]] %s2411_s0  ;;  %1653 = vmatprep.subr.mxu0 %v1868_v2  ;;  %1672 = vmatprep.subr.mxu1 %v1868_v2  ;;  %s1870_s0 = smov 46   ;;  %v113_v6 = vld [vmem:[%s2412_s3] sm:$0xff]  ;;  %vm119_vm2 = vcmask 523264   ;;  %vm198_vm3 = vcmask 302080   ;;  %vm260_vm4 = vcmask 588800  }
   0x2   :  { %s2430_s23 = sld [smem:[#allocation2_spill]]  ;;  %s1872_s18 = smov 47   ;;  %1669 = vmatprep.mubr.msk.f32.mxu0 %vm1873_vm0, %v1868_v2  ;;  %1690 = vmatprep.mubr.msk.f32.mxu1 %vm1873_vm0, %v1868_v2  ;;  %v112_v29 = vld [vmem:[%s2413_s2] sm:$0xff]  ;;  %vm362_vm5 = vcmask 1044480   ;;  %v1514_v62 = vld [vmem:[%s2416_s6 + $0x48] sm:$0x1f] }
   0x3   :  { %s1874_s19 = smov 127   ;;  %s1875_s20 = smov 54   ;;  %1857 = vset.pattern.permute.xlu0 %v1876_v5  ;;  %v254_v35 = vld [vmem:[%s2414_s5] sm:$0xff]  ;;  %v1511_v5 = vld [vmem:[%s2416_s6 + $0x30] sm:$0xff]  ;;  %vm340_vm6 = vcmask 1040384   ;;  %vm1050_vm7 = vcmask 254976  }
   0x4   :  { %s1877_s21 = smov 55   ;;  %s1878_s25 = smov 111   ;;  %v253_v60 = vld [vmem:[%s2415_s4] sm:$0xff]  ;;  %vm1092_vm8 = vcmask 261120   ;;  %vm1447_vm9 = vcmask 41984   ;;  %vm1470_vm10 = vcmask 48128  }
   0x5   :  { %s1879_s2 = smov 110   ;;  %s1880_s27 = smov 112   ;;  %v1513_v63 = vld [vmem:[%s2416_s6 + $0x40] sm:$0xff]  ;;  %vm1472_vm11 = vcmask 97280   ;;  %vm1474_vm12 = vcmask 146432   ;;  %vm1501_vm13 = vcmask 147456  }
   0x6   :  { %s1881_s28 = smov 92   ;;  %s1882_s29 = smov 118  }
   0x7   :  { %s1883_s30 = smov 93   ;;  %s1888_s22 = smov 102  }
   0x8   :  { %v1983_v0 = vld [vmem:[%s2430_s23 + $0x8] sm:$0xff]  ;;  %v1988_v1 = vld [vmem:[%s2430_s23] sm:$0xff]  ;;  %v56_v3 = vld [vmem:[%s2430_s23 + $0x18] sm:$0xff]  ;;  %s1890_s3 = smov 109  }
   0x9   :  { %100 = vrot.lane.b32.xlu0 %v1983_v0, %s1869_s26  ;;  %98 = vrot.lane.b32.xlu1 %v1988_v1, %s1869_s26  ;;  %v55_v4 = vld [vmem:[%s2430_s23 + $0x10] sm:$0xff] }
   0xd   :  { %106 = vrot.lane.b32.xlu0 %v56_v3, %s1870_s0  ;;  %104 = vrot.lane.b32.xlu1 %v55_v4, %s1870_s0  ;;  %s1884_s0 = smov 94  }
  0x11   :  { %86 = vrot.lane.b32.xlu0 %v1983_v0, %s1871_s17  ;;  %92 = vrot.lane.b32.xlu1 %v56_v3, %s1872_s18 }
  0x15   :  { %84 = vrot.lane.b32.xlu0 %v1988_v1, %s1871_s17  ;;  %90 = vrot.lane.b32.xlu1 %v55_v4, %s1872_s18  ;;  %s1885_s18 = smov 100  }
  0x19   :  { %72 = vrot.lane.b32.xlu0 %v1983_v0, %s1874_s19  ;;  %78 = vrot.lane.b32.xlu1 %v56_v3, %s1875_s20 }
  0x1d   :  { %70 = vrot.lane.b32.xlu0 %v1988_v1, %s1874_s19  ;;  %76 = vrot.lane.b32.xlu1 %v55_v4, %s1875_s20  ;;  %s1886_s20 = smov 126  }
  0x21   :  { %61 = vrot.lane.b32.xlu0 %v56_v3, %s1877_s21  ;;  %59 = vrot.lane.b32.xlu1 %v55_v4, %s1877_s21  ;;  %s1887_s21 = smov 101   ;;  %v1512_v3 = vld [vmem:[%s2416_s6 + $0x38] sm:$0xff]  ;;  %v1524_v4 = vld [vmem:[%s2416_s6 + $0x88] sm:$0xff] }
  0x25   :  { %116 = vperm.xlu0 %1857, %v113_v6   ;;  %v1523_v6 = vld [vmem:[%s2416_s6 + $0x80] sm:$0xff] }
  0x7b   :  { %v101_v7 = vpop.permute.xlu0 %100  ;;  %v99_v8 = vpop.permute.xlu1 %98 }
  0x7f   :  { %v107_v9 = vpop.permute.xlu0 %106  ;;  %v105_v10 = vpop.permute.xlu1 %104 }
  0x80   :  { %v111_v11 = vsel %vm65_vm1, %v101_v7, %v107_v9  ;;  %v110_v12 = vsel %vm65_vm1, %v99_v8, %v105_v10  ;;  %v1510_v7 = vld [vmem:[%s2416_s6 + $0x28] sm:$0xff]  ;;  %v1522_v8 = vld [vmem:[%s2416_s6 + $0x78] sm:$0xff] }
  0x81   :  { %1654 = vmatpush3.msra.mxu0 %v111_v11 }
  0x82   :  { %1655 = vmatprep.subr.mxu0 %v1868_v2 }
  0x83   :  { %v87_v13 = vpop.permute.xlu0 %86  ;;  %1656 = vmatpush3.msra.mxu0 %v110_v12  ;;  %v93_v14 = vpop.permute.xlu1 %92 }
  0x84   :  { %1657 = vmatprep.subr.mxu0 %v1868_v2  ;;  %v97_v15 = vsel %vm65_vm1, %v87_v13, %v93_v14 }
  0x85   :  { %1658 = vmatpush3.msra.mxu0 %v97_v15 }
  0x86   :  { %1659 = vmatprep.subr.mxu0 %v1868_v2 }
  0x87   :  { %v85_v16 = vpop.permute.xlu0 %84  ;;  %v91_v17 = vpop.permute.xlu1 %90 }
  0x88   :  { %v96_v18 = vsel %vm65_vm1, %v85_v16, %v91_v17 }
  0x89   :  { %1660 = vmatpush3.msra.mxu0 %v96_v18 }
  0x8a   :  { %1661 = vmatprep.subr.mxu0 %v1868_v2 }
  0x8b   :  { %v73_v19 = vpop.permute.xlu0 %72  ;;  %v79_v20 = vpop.permute.xlu1 %78 }
  0x8c   :  { %v83_v21 = vsel %vm65_vm1, %v73_v19, %v79_v20 }
  0x8d   :  { %1662 = vmatpush3.msra.mxu0 %v83_v21 }
  0x8e   :  { %1663 = vmatprep.subr.mxu0 %v1868_v2 }
  0x8f   :  { %v71_v22 = vpop.permute.xlu0 %70  ;;  %v77_v23 = vpop.permute.xlu1 %76 }
  0x90   :  { %v82_v24 = vsel %vm65_vm1, %v71_v22, %v77_v23  ;;  %v1538_v22 = vld [vmem:[%s2416_s6 + $0xe8] sm:$0x1f] }
  0x91   :  { %1664 = vmatpush3.msra.mxu0 %v82_v24 }
  0x92   :  { %1665 = vmatprep.subr.mxu0 %v1868_v2 }
  0x93   :  { %v62_v25 = vpop.permute.xlu0 %61  ;;  %v60_v26 = vpop.permute.xlu1 %59 }
  0x94   :  { %v67_v27 = vsel %vm65_vm1, %v1983_v0, %v62_v25  ;;  %v66_v28 = vsel %vm65_vm1, %v1988_v1, %v60_v26  ;;  %v1526_v0 = vld [vmem:[%s2416_s6 + $0x98] sm:$0x1f]  ;;  %v1525_v1 = vld [vmem:[%s2416_s6 + $0x90] sm:$0xff]  ;;  %v1537_v25 = vld [vmem:[%s2416_s6 + $0xe0] sm:$0xff] }
  0x95   :  { %1666 = vmatpush3.msra.mxu0 %v67_v27  ;;  %v1550_v26 = vld [vmem:[%s2416_s6 + $0x138] sm:$0x1f] }
  0x96   :  { %1667 = vmatprep.subr.mxu0 %v1868_v2 }
  0x97   :  { %1668 = vmatpush3.msra.mxu0 %v66_v28  ;;  %v1549_v28 = vld [vmem:[%s2416_s6 + $0x130] sm:$0xff] }
  0x98   :  { %1670 = vmatmul.mubr.msk.f32.vlgmr.msra.gmra.mxu0 %vm119_vm2, %v112_v29  ;;  %1693 = vmatprep.subr.mxu0 %v1868_v2  ;;  %v1536_v29 = vld [vmem:[%s2416_s6 + $0xd8] sm:$0xff] }
  0x99   :  { %1703 = vmatprep.mubr.msk.f32.mxu0 %vm1873_vm0, %v1868_v2  ;;  %1694 = vmatpush3.msk.msra.mxu0 %vm362_vm5, %v1514_v62  ;;  %v1542_v62 = vld [vmem:[%s2416_s6 + $0xf8] sm:$0xff] }
  0x9a   :  { %1695 = vmatprep.subr.mxu0 %v1868_v2 }
  0x9b   :  { %1696 = vmatpush3.msra.mxu0 %v1513_v63 }
  0x9c   :  { %1697 = vmatprep.subr.mxu0 %v1868_v2 }
  0x9d   :  { %1698 = vmatpush3.msra.mxu0 %v1512_v3 }
  0x9e   :  { %1699 = vmatprep.subr.mxu0 %v1868_v2 }
  0x9f   :  { %1700 = vmatpush3.msra.mxu0 %v1511_v5 }
  0xa0   :  { %v117_v30 = vpop.permute.xlu0 %116  ;;  %1701 = vmatprep.subr.mxu0 %v1868_v2 }
  0xa1   :  { %1702 = vmatpush3.msra.mxu0 %v1510_v7 }
  0xa2   :  { %1719 = vmatprep.subr.mxu0 %v1868_v2 }
 0x158   :  { %v189_v31 = vpop.f32.mrf.mxu0 }
 0x159   :  { %v190_v32 = vadd.f32 %v189_v31, %v117_v30  ;;  %v1535_v30 = vld [vmem:[%s2416_s6 + $0xd0] sm:$0xff]  ;;  %v1548_v31 = vld [vmem:[%s2416_s6 + $0x128] sm:$0xff] }
 0x15a   :  { %v1671_v33 = vpop.f32.mrf.mxu0 }
 0x15b   :  { %v2040_v34 = vmax.f32 %v190_v32, 0.0  ;;  %v1547_v33 = vld [vmem:[%s2416_s6 + $0x120] sm:$0xff] }
 0x15d   :  { %242 = vrot.lane.b32.xlu0 %v2040_v34, %s1878_s25  ;;  %195 = vrot.lane.b32.xlu1 %v2040_v34, %s1879_s2  ;;  %s1891_s25 = smov 91  }
 0x161   :  { %235 = vrot.lane.b32.xlu0 %v2040_v34, %s1880_s27  ;;  %249 = vrot.lane.b32.xlu1 %v2040_v34, %s1881_s28 }
 0x165   :  { %228 = vrot.lane.b32.xlu0 %v2040_v34, %s1882_s29  ;;  %245 = vrot.lane.b32.xlu1 %v2040_v34, %s1883_s30 }
 0x169   :  { %221 = vrot.lane.b32.xlu0 %v2040_v34, %s1869_s26  ;;  %238 = vrot.lane.b32.xlu1 %v2040_v34, %s1884_s0 }
 0x16d   :  { %214 = vrot.lane.b32.xlu0 %v2040_v34, %s1871_s17  ;;  %231 = vrot.lane.b32.xlu1 %v2040_v34, %s1885_s18  ;;  %s1889_s17 = smov 108  }
 0x171   :  { %207 = vrot.lane.b32.xlu0 %v2040_v34, %s1886_s20  ;;  %224 = vrot.lane.b32.xlu1 %v2040_v34, %s1887_s21 }
 0x175   :  { %200 = vrot.lane.b32.xlu0 %v2040_v34, %s1874_s19  ;;  %217 = vrot.lane.b32.xlu1 %v2040_v34, %s1888_s22 }
 0x179   :  { %257 = vperm.xlu0 %1857, %v254_v35   ;;  %210 = vrot.lane.b32.xlu1 %v2040_v34, %s1889_s17  ;;  %v1546_v35 = vld [vmem:[%s2416_s6 + $0x118] sm:$0xff] }
 0x17d   :  { %203 = vrot.lane.b32.xlu1 %v2040_v34, %s1890_s3 }
 0x1cf   :  { %v243_v36 = vpop.permute.xlu0 %242  ;;  %v196_v37 = vpop.permute.xlu1 %195 }
 0x1d0   :  { %v199_v61 = vsel %vm198_vm3, %v2040_v34, %v196_v37  ;;  %v1534_v34 = vld [vmem:[%s2416_s6 + $0xc8] sm:$0xff] }
 0x1d3   :  { %v236_v38 = vpop.permute.xlu0 %235  ;;  %v250_v39 = vpop.permute.xlu1 %249 }
 0x1d4   :  { %v252_v40 = vsel %vm198_vm3, %v196_v37, %v250_v39  ;;  %v345_v39 = vld [vmem:[%s2416_s6 + $0x18] sm:$0xff] }
 0x1d5   :  { %1673 = vmatpush3.msra.mxu1 %v252_v40 }
 0x1d6   :  { %1674 = vmatprep.subr.mxu1 %v1868_v2 }
 0x1d7   :  { %v229_v41 = vpop.permute.xlu0 %228  ;;  %v246_v42 = vpop.permute.xlu1 %245 }
 0x1d8   :  { %v248_v43 = vsel %vm198_vm3, %v243_v36, %v246_v42  ;;  %v344_v42 = vld [vmem:[%s2416_s6 + $0x10] sm:$0xff] }
 0x1d9   :  { %1675 = vmatpush3.msra.mxu1 %v248_v43  ;;  %v1520_v43 = vld [vmem:[%s2416_s6 + $0x68] sm:$0xff] }
 0x1da   :  { %1676 = vmatprep.subr.mxu1 %v1868_v2 }
 0x1db   :  { %v239_v44 = vpop.permute.xlu1 %238  ;;  %v222_v46 = vpop.permute.xlu0 %221 }
 0x1dc   :  { %v241_v45 = vsel %vm198_vm3, %v236_v38, %v239_v44  ;;  %v346_v38 = vld [vmem:[%s2416_s6 + $0x20] sm:$0x1f]  ;;  %v343_v44 = vld [vmem:[%s2416_s6 + $0x8] sm:$0xff] }
 0x1dd   :  { %1677 = vmatpush3.msra.mxu1 %v241_v45  ;;  %v1519_v45 = vld [vmem:[%s2416_s6 + $0x60] sm:$0xff] }
 0x1de   :  { %1678 = vmatprep.subr.mxu1 %v1868_v2 }
 0x1df   :  { %v232_v47 = vpop.permute.xlu1 %231  ;;  %v215_v49 = vpop.permute.xlu0 %214 }
 0x1e0   :  { %v234_v48 = vsel %vm198_vm3, %v229_v41, %v232_v47  ;;  %v1521_v41 = vld [vmem:[%s2416_s6 + $0x70] sm:$0x1f] }
 0x1e1   :  { %1679 = vmatpush3.msra.mxu1 %v234_v48  ;;  %v1518_v48 = vld [vmem:[%s2416_s6 + $0x58] sm:$0xff] }
 0x1e2   :  { %1680 = vmatprep.subr.mxu1 %v1868_v2 }
 0x1e3   :  { %v225_v50 = vpop.permute.xlu1 %224  ;;  %v208_v54 = vpop.permute.xlu0 %207 }
 0x1e4   :  { %v227_v51 = vsel %vm198_vm3, %v222_v46, %v225_v50  ;;  %v342_v46 = vld [vmem:[%s2416_s6] sm:$0xff] }
 0x1e5   :  { %1681 = vmatpush3.msra.mxu1 %v227_v51 }
 0x1e6   :  { %1682 = vmatprep.subr.mxu1 %v1868_v2 }
 0x1e7   :  { %v218_v52 = vpop.permute.xlu1 %217  ;;  %v201_v57 = vpop.permute.xlu0 %200 }
 0x1e8   :  { %v220_v53 = vsel %vm198_vm3, %v215_v49, %v218_v52  ;;  %v1517_v49 = vld [vmem:[%s2416_s6 + $0x50] sm:$0xff]  ;;  %v1533_v52 = vld [vmem:[%s2416_s6 + $0xc0] sm:$0x1f] }
 0x1e9   :  { %1683 = vmatpush3.msra.mxu1 %v220_v53  ;;  %v1532_v53 = vld [vmem:[%s2416_s6 + $0xb8] sm:$0xff] }
 0x1ea   :  { %1684 = vmatprep.subr.mxu1 %v1868_v2 }
 0x1eb   :  { %v211_v55 = vpop.permute.xlu1 %210 }
 0x1ec   :  { %v213_v56 = vsel %vm198_vm3, %v208_v54, %v211_v55  ;;  %v1545_v55 = vld [vmem:[%s2416_s6 + $0x110] sm:$0x1f] }
 0x1ed   :  { %1685 = vmatpush3.msra.mxu1 %v213_v56  ;;  %v1531_v56 = vld [vmem:[%s2416_s6 + $0xb0] sm:$0xff] }
 0x1ee   :  { %1686 = vmatprep.subr.mxu1 %v1868_v2 }
 0x1ef   :  { %v204_v58 = vpop.permute.xlu1 %203 }
 0x1f0   :  { %v206_v59 = vsel %vm198_vm3, %v201_v57, %v204_v58  ;;  %v1544_v57 = vld [vmem:[%s2416_s6 + $0x108] sm:$0xff] }
 0x1f1   :  { %1687 = vmatpush3.msra.mxu1 %v206_v59  ;;  %v1530_v58 = vld [vmem:[%s2416_s6 + $0xa8] sm:$0xff]  ;;  %v1543_v59 = vld [vmem:[%s2416_s6 + $0x100] sm:$0xff] }
 0x1f2   :  { %1688 = vmatprep.subr.mxu1 %v1868_v2 }
 0x1f3   :  { %1689 = vmatpush3.msra.mxu1 %v199_v61 }
 0x1f4   :  { %1691 = vmatmul.mubr.msk.f32.vlgmr.msra.gmra.mxu1 %vm260_vm4, %v253_v60  ;;  %1706 = vmatprep.subr.mxu1 %v1868_v2  ;;  %v258_v9 = vpop.permute.xlu0 %257  ;;  %v1529_v60 = vld [vmem:[%s2416_s6 + $0xa0] sm:$0xff] }
 0x1f5   :  { %1716 = vmatprep.mubr.msk.f32.mxu1 %vm1873_vm0, %v1868_v2  ;;  %1707 = vmatpush3.msk.msra.mxu1 %vm362_vm5, %v1526_v0  ;;  %v1541_v0 = vld [vmem:[%s2416_s6 + $0xf0] sm:$0xff] }
 0x1f6   :  { %1708 = vmatprep.subr.mxu1 %v1868_v2 }
 0x1f7   :  { %1709 = vmatpush3.msra.mxu1 %v1525_v1 }
 0x1f8   :  { %1710 = vmatprep.subr.mxu1 %v1868_v2 }
 0x1f9   :  { %1711 = vmatpush3.msra.mxu1 %v1524_v4 }
 0x1fa   :  { %1712 = vmatprep.subr.mxu1 %v1868_v2 }
 0x1fb   :  { %1713 = vmatpush3.msra.mxu1 %v1523_v6 }
 0x1fc   :  { %1714 = vmatprep.subr.mxu1 %v1868_v2 }
 0x1fd   :  { %1715 = vmatpush3.msra.mxu1 %v1522_v8 }
 0x1fe   :  { %1732 = vmatprep.subr.mxu1 %v1868_v2 }
 0x2b4   :  { %v330_v10 = vpop.f32.mrf.mxu1 }
 0x2b5   :  { %v331_v11 = vadd.f32 %v330_v10, %v258_v9 }
 0x2b6   :  { %v1692_v12 = vpop.f32.mrf.mxu1 }
 0x2b7   :  { %v2130_v13 = vmax.f32 %v331_v11, 0.0 }
 0x2b9   :  { %349 = vrot.lane.b32.xlu1 %v2130_v13, %s1891_s25  ;;  %v436_v14 = vrot.slane %v2130_v13, 2  ;;  %v536_v15 = vrot.slane %v2130_v13, 4  ;;  %v636_v16 = vrot.slane %v2130_v13, 6  ;;  %v336_v17 = vrot.slane %v2130_v13, 7 }
 0x2ba   :  { %v347_v18 = vrot.slane %v2130_v13, 1  ;;  %v448_v19 = vrot.slane %v2130_v13, 3  ;;  %v548_v20 = vrot.slane %v2130_v13, 5 }
 0x2bb   :  { %450 = vrot.lane.b32.xlu0 %v436_v14, %s1891_s25 }
 0x2bd   :  { %550 = vrot.lane.b32.xlu1 %v536_v15, %s1891_s25 }
 0x2bf   :  { %649 = vrot.lane.b32.xlu0 %v636_v16, %s1891_s25 }
 0x2c1   :  { %337 = vrot.lane.b32.xlu1 %v336_v17, %s1891_s25 }
 0x2c3   :  { %438 = vrot.lane.b32.xlu0 %v347_v18, %s1891_s25 }
 0x2c5   :  { %538 = vrot.lane.b32.xlu1 %v448_v19, %s1891_s25 }
 0x2c7   :  { %638 = vrot.lane.b32.xlu0 %v548_v20, %s1891_s25 }
 0x32b   :  { %v350_v21 = vpop.permute.xlu1 %349 }
 0x32c   :  { %v352_v23 = vsel %vm340_vm6, %v347_v18, %v350_v21 }
 0x32d   :  { %v451_v24 = vpop.permute.xlu0 %450  ;;  %1704 = vmatmul.mubr.msk.f32.vlgmr.msra.gmra.mxu0 %vm198_vm3, %v352_v23 }
 0x32e   :  { %v453_v27 = vsel %vm340_vm6, %v448_v19, %v451_v24  ;;  %1720 = vmatpush3.msk.msra.mxu0 %vm362_vm5, %v1538_v22  ;;  %1729 = vmatprep.mubr.msk.f32.mxu0 %vm1873_vm0, %v1868_v2 }
 0x32f   :  { %1721 = vmatprep.subr.mxu0 %v1868_v2  ;;  %1717 = vmatmul.mubr.msk.f32.vlgmr.msra.gmra.mxu1 %vm198_vm3, %v453_v27  ;;  %v551_v32 = vpop.permute.xlu1 %550 }
 0x330   :  { %1722 = vmatpush3.msra.mxu0 %v1537_v25  ;;  %1733 = vmatpush3.msk.msra.mxu1 %vm362_vm5, %v1550_v26  ;;  %v553_v36 = vsel %vm340_vm6, %v548_v20, %v551_v32  ;;  %v1561_v26 = vld [vmem:[%s2417_s7] ss:$0 sm:$0xff] }
 0x331   :  { %1723 = vmatprep.subr.mxu0 %v1868_v2  ;;  %1734 = vmatprep.subr.mxu1 %v1868_v2  ;;  %v650_v37 = vpop.permute.xlu0 %649 }
 0x332   :  { %1735 = vmatpush3.msra.mxu1 %v1549_v28  ;;  %1724 = vmatpush3.msra.mxu0 %v1536_v29  ;;  %v652_v40 = vsel %vm340_vm6, %v336_v17, %v650_v37  ;;  %v1082_v37 = vld [vmem:[%s2418_s10 + $0x8] sm:$0xff] }
 0x333   :  { %1725 = vmatprep.subr.mxu0 %v1868_v2  ;;  %1736 = vmatprep.subr.mxu1 %v1868_v2  ;;  %v338_v47 = vpop.permute.xlu1 %337 }
 0x334   :  { %1726 = vmatpush3.msra.mxu0 %v1535_v30  ;;  %1737 = vmatpush3.msra.mxu1 %v1548_v31  ;;  %v341_v50 = vsel %vm340_vm6, %v2130_v13, %v338_v47 }
 0x335   :  { %1727 = vmatprep.subr.mxu0 %v1868_v2  ;;  %1738 = vmatprep.subr.mxu1 %v1868_v2  ;;  %v439_v51 = vpop.permute.xlu0 %438 }
 0x336   :  { %1739 = vmatpush3.msra.mxu1 %v1547_v33  ;;  %1728 = vmatpush3.msra.mxu0 %v1534_v34  ;;  %v441_v54 = vsel %vm340_vm6, %v436_v14, %v439_v51  ;;  %v1167_v51 = vld [vmem:[%s2419_s12] sm:$0xff] }
 0x337   :  { %1730 = vmatmul.mubr.msk.f32.vlgmr.msra.gmra.mxu0 %vm198_vm3, %v553_v36  ;;  %1740 = vmatprep.subr.mxu1 %v1868_v2  ;;  %v539_v61 = vpop.permute.xlu1 %538  ;;  %v1083_v36 = vld [vmem:[%s2418_s10 + $0x10] sm:$0xff] }
 0x338   :  { %1745 = vmatprep.subr.mxu0 %v1868_v2  ;;  %1741 = vmatpush3.msra.mxu1 %v1546_v35  ;;  %v541_v1 = vsel %vm340_vm6, %v536_v15, %v539_v61  ;;  %v1084_v35 = vld [vmem:[%s2418_s10 + $0x18] sm:$0xff]  ;;  %v1566_v61 = vld [vmem:[%s2424_s13] ss:$0 sm:$0xff]  ;;  %s1893_s13 = smov 122  }
 0x339   :  { %1742 = vmatprep.mubr.msk.f32.mxu1 %vm1873_vm0, %v1868_v2  ;;  %1746 = vmatpush3.msk.msra.mxu0 %vm362_vm5, %v346_v38  ;;  %v639_v63 = vpop.permute.xlu0 %638  ;;  %v1081_v38 = vld [vmem:[%s2418_s10] sm:$0xff] }
 0x33a   :  { %1743 = vmatmul.mubr.msk.f32.vlgmr.msra.gmra.mxu1 %vm198_vm3, %v652_v40  ;;  %1747 = vmatprep.subr.mxu0 %v1868_v2  ;;  %v641_v3 = vsel %vm340_vm6, %v636_v16, %v639_v63 }
 0x33b   :  { %1758 = vmatprep.subr.mxu1 %v1868_v2  ;;  %1748 = vmatpush3.msra.mxu0 %v345_v39  ;;  %v1170_v39 = vld [vmem:[%s2419_s12 + $0x18] sm:$0xff] }
 0x33c   :  { %1759 = vmatpush3.msk.msra.mxu1 %vm362_vm5, %v1521_v41  ;;  %1749 = vmatprep.subr.mxu0 %v1868_v2 }
 0x33d   :  { %1760 = vmatprep.subr.mxu1 %v1868_v2  ;;  %1750 = vmatpush3.msra.mxu0 %v344_v42 }
 0x33e   :  { %1761 = vmatpush3.msra.mxu1 %v1520_v43  ;;  %1751 = vmatprep.subr.mxu0 %v1868_v2 }
 0x33f   :  { %1762 = vmatprep.subr.mxu1 %v1868_v2  ;;  %1752 = vmatpush3.msra.mxu0 %v343_v44  ;;  %v1562_v44 = vld [vmem:[%s2420_s8] ss:$0 sm:$0xff] }
 0x340   :  { %1763 = vmatpush3.msra.mxu1 %v1519_v45  ;;  %1753 = vmatprep.subr.mxu0 %v1868_v2 }
 0x341   :  { %1764 = vmatprep.subr.mxu1 %v1868_v2  ;;  %1754 = vmatpush3.msra.mxu0 %v342_v46  ;;  %v1563_v46 = vld [vmem:[%s2421_s9] ss:$0 sm:$0xff] }
 0x342   :  { %1755 = vmatprep.mubr.msk.f32.mxu0 %vm1873_vm0, %v1868_v2  ;;  %1765 = vmatpush3.msra.mxu1 %v1518_v48 }
 0x343   :  { %1756 = vmatmul.mubr.msk.f32.vlgmr.msra.gmra.mxu0 %vm198_vm3, %v341_v50  ;;  %1766 = vmatprep.subr.mxu1 %v1868_v2  ;;  %v1168_v50 = vld [vmem:[%s2419_s12 + $0x8] sm:$0xff] }
 0x344   :  { %1771 = vmatprep.subr.mxu0 %v1868_v2  ;;  %1767 = vmatpush3.msra.mxu1 %v1517_v49  ;;  %v1169_v49 = vld [vmem:[%s2419_s12 + $0x10] sm:$0xff] }
 0x345   :  { %1768 = vmatprep.mubr.msk.f32.mxu1 %vm1873_vm0, %v1868_v2  ;;  %1772 = vmatpush3.msk.msra.mxu0 %vm362_vm5, %v1533_v52  ;;  %v1255_v52 = vld [vmem:[%s2422_s14 + $0x18] sm:$0xff] }
 0x346   :  { %1769 = vmatmul.mubr.msk.f32.vlgmr.msra.gmra.mxu1 %vm198_vm3, %v441_v54  ;;  %1773 = vmatprep.subr.mxu0 %v1868_v2 }
 0x347   :  { %1784 = vmatprep.subr.mxu1 %v1868_v2  ;;  %1774 = vmatpush3.msra.mxu0 %v1532_v53  ;;  %v1564_v53 = vld [vmem:[%s2423_s11] ss:$0 sm:$0xff] }
 0x348   :  { %1785 = vmatpush3.msk.msra.mxu1 %vm362_vm5, %v1545_v55  ;;  %1775 = vmatprep.subr.mxu0 %v1868_v2 }
 0x349   :  { %1786 = vmatprep.subr.mxu1 %v1868_v2  ;;  %1776 = vmatpush3.msra.mxu0 %v1531_v56 }
 0x34a   :  { %1787 = vmatpush3.msra.mxu1 %v1544_v57  ;;  %1777 = vmatprep.subr.mxu0 %v1868_v2 }
 0x34b   :  { %1788 = vmatprep.subr.mxu1 %v1868_v2  ;;  %1778 = vmatpush3.msra.mxu0 %v1530_v58  ;;  %v1254_v58 = vld [vmem:[%s2422_s14 + $0x10] sm:$0xff] }
 0x34c   :  { %1789 = vmatpush3.msra.mxu1 %v1543_v59  ;;  %1779 = vmatprep.subr.mxu0 %v1868_v2  ;;  %v1253_v59 = vld [vmem:[%s2422_s14 + $0x8] sm:$0xff] }
 0x34d   :  { %1790 = vmatprep.subr.mxu1 %v1868_v2  ;;  %1780 = vmatpush3.msra.mxu0 %v1529_v60  ;;  %v1252_v60 = vld [vmem:[%s2422_s14] sm:$0xff] }
 0x34e   :  { %1781 = vmatprep.mubr.msk.f32.mxu0 %vm1873_vm0, %v1868_v2  ;;  %1791 = vmatpush3.msra.mxu1 %v1542_v62 }
 0x34f   :  { %1782 = vmatmul.mubr.msk.f32.vlgmr.msra.gmra.mxu0 %vm198_vm3, %v541_v1  ;;  %1792 = vmatprep.subr.mxu1 %v1868_v2 }
 0x350   :  { %1793 = vmatpush3.msra.mxu1 %v1541_v0  ;;  %1794 = vmatprep.mubr.msk.f32.mxu1 %vm1873_vm0, %v1868_v2 }
 0x351   :  { %1795 = vmatmul.mubr.msk.f32.vlgmr.msra.gmra.mxu1 %vm198_vm3, %v641_v3  ;;  %1797 = vmatprep.subr.mxu0 %v1868_v2  ;;  %v1568_v3 = vld [vmem:[%s2425_s15] ss:$0 sm:$0xff] }
 0x352   :  { %1805 = vmatprep.mubr.msk.f32.mxu0 %vm1873_vm0, %v1868_v2  ;;  %1808 = vmatprep.subr.mxu1 %v1868_v2 }
 0x353   :  { %1816 = vmatprep.mubr.msk.f32.mxu1 %vm1873_vm0, %v1868_v2  ;;  %1798 = vmatpush3.msra.mxu0 %v1084_v35 }
 0x354   :  { %1799 = vmatprep.subr.mxu0 %v1868_v2  ;;  %1809 = vmatpush3.msra.mxu1 %v1170_v39 }
 0x355   :  { %1800 = vmatpush3.msra.mxu0 %v1083_v36  ;;  %1810 = vmatprep.subr.mxu1 %v1868_v2 }
 0x356   :  { %1801 = vmatprep.subr.mxu0 %v1868_v2  ;;  %1811 = vmatpush3.msra.mxu1 %v1169_v49 }
 0x357   :  { %1802 = vmatpush3.msra.mxu0 %v1082_v37  ;;  %1812 = vmatprep.subr.mxu1 %v1868_v2 }
 0x358   :  { %1803 = vmatprep.subr.mxu0 %v1868_v2  ;;  %1813 = vmatpush3.msra.mxu1 %v1168_v50 }
 0x359   :  { %1804 = vmatpush3.msra.mxu0 %v1081_v38  ;;  %1814 = vmatprep.subr.mxu1 %v1868_v2 }
 0x35a   :  { %1819 = vmatprep.subr.mxu0 %v1868_v2  ;;  %1815 = vmatpush3.msra.mxu1 %v1167_v51 }
 0x3ed   :  { %v432_v4 = vpop.f32.mrf.mxu0 }
 0x3ef   :  { %v1705_v5 = vpop.f32.mrf.mxu0  ;;  %v532_v6 = vpop.f32.mrf.mxu1 }
 0x3f1   :  { %v1718_v7 = vpop.f32.mrf.mxu1 }
 0x3f7   :  { %v632_v8 = vpop.f32.mrf.mxu0 }
 0x3f9   :  { %v1731_v9 = vpop.f32.mrf.mxu0 }
 0x3fa   :  { %v731_v10 = vpop.f32.mrf.mxu1 }
 0x3fc   :  { %v1744_v11 = vpop.f32.mrf.mxu1 }
 0x3fd   :  { %v1892_v11 = vmov 1966171168  }
 0x403   :  { %v807_v12 = vpop.f32.mrf.mxu0 }
 0x404   :  { %v808_v20 = vadd.f32 %v807_v12, %v432_v4  ;;  %v1346_v12 = vunpack.c.l.s4 %v1892_v11 }
 0x405   :  { %v1757_v13 = vpop.f32.mrf.mxu0 }
 0x406   :  { %v883_v14 = vpop.f32.mrf.mxu1  ;;  %v1348_v13 = vlaneseq }
 0x407   :  { %v884_v17 = vadd.f32 %v883_v14, %v532_v6  ;;  %v1347_v14 = vunpack.c.0.s8 %v1346_v12 }
 0x408   :  { %v1770_v15 = vpop.f32.mrf.mxu1 }
 0x409   :  { %v1039_v24 = vadd.f32 %v884_v17, %v808_v20  ;;  %v1349_v15 = vshrl.u32 %v1348_v13, 7 }
 0x40f   :  { %v959_v16 = vpop.f32.mrf.mxu0 }
 0x410   :  { %v960_v21 = vadd.f32 %v959_v16, %v632_v8  ;;  %v2383_v16 = vsub.s32 %v1347_v14, %v1349_v15 }
 0x411   :  { %v1783_v18 = vpop.f32.mrf.mxu0  ;;  %v1035_v19 = vpop.f32.mrf.mxu1 }
 0x412   :  { %v1036_v22 = vadd.f32 %v1035_v19, %v731_v10 }
 0x413   :  { %v1796_v23 = vpop.f32.mrf.mxu1 }
 0x414   :  { %v1040_v25 = vadd.f32 %v1036_v22, %v960_v21 }
 0x416   :  { %v1041_v27 = vadd.f32 %v1040_v25, %v1039_v24 }
 0x418   :  { %v1049_v28 = vadd.f32 %v1561_v26, %v1041_v27  ;;  %v1343_v26 = vld [vmem:[%s2426_s1 + $0x1] sm:$0x1]  ;;  %v1342_v27 = vld [vmem:[%s2426_s1] sm:$0x1]  ;;  %s1894_s1 = smov 6  }
 0x41a   :  { %v1051_v29 = vsel %vm1050_vm7, %v1049_v28, 0.0 }
 0x41b   :  { %1052 = vadd.xlane.f32.xlu1 %v1051_v29  ;;  %v1394_v29 = vmul.f32 -0.5, %v1342_v27 }
 0x41d   :  { %v1396_v35 = vmul.f32 %v1394_v29, %v1342_v27 }
 0x4a4   :  { %v1053_v30 = vpop.xlane.xlu1 %1052 }
 0x4a5   :  { %v1055_v31 = vmul.f32 0.03125, %v1053_v30 }
 0x4a7   :  { %v1056_v32 = vsub.f32 %v1049_v28, %v1055_v31  ;;  %v1395_v28 = vmul.f32 -0.5, %v1343_v26 }
 0x4a9   :  { %v1057_v33 = vmul.f32 %v1056_v32, %v1056_v32 }
 0x4ab   :  { %v1058_v34 = vsel %vm1050_vm7, %v1057_v33, 0.0 }
 0x4ac   :  { %1059 = vadd.xlane.f32.xlu0 %v1058_v34  ;;  %v1397_v34 = vmul.f32 %v1395_v28, %v1343_v26 }
 0x535   :  { %v1060_v40 = vpop.xlane.xlu0 %1059 }
 0x536   :  { %v1061_v41 = vmul.f32 0.03125, %v1060_v40 }
 0x538   :  { %v1062_v42 = vadd.f32 1e-05, %v1061_v41 }
 0x53a   :  { %1858 = vrsqrt.f32 %v1062_v42 }
 0x547   :  { %v1859_v43 = vpop.eup %1858 }
 0x548   :  { %v1064_v45 = vmul.f32 %v1859_v43, %v1056_v32 }
 0x54a   :  { %v1072_v47 = vmul.f32 %v1562_v44, %v1064_v45 }
 0x54c   :  { %v1080_v48 = vadd.f32 %v1563_v46, %v1072_v47 }
 0x54e   :  { %1806 = vmatmul.mubr.msk.f32.vlgmr.msra.gmra.mxu0 %vm1092_vm8, %v1080_v48 }
 0x54f   :  { %1827 = vmatprep.mubr.msk.f32.mxu0 %vm1873_vm0, %v1868_v2  ;;  %1820 = vmatpush3.msra.mxu0 %v1255_v52 }
 0x550   :  { %1821 = vmatprep.subr.mxu0 %v1868_v2 }
 0x551   :  { %1822 = vmatpush3.msra.mxu0 %v1254_v58 }
 0x552   :  { %1823 = vmatprep.subr.mxu0 %v1868_v2 }
 0x553   :  { %1824 = vmatpush3.msra.mxu0 %v1253_v59 }
 0x554   :  { %1825 = vmatprep.subr.mxu0 %v1868_v2 }
 0x555   :  { %1826 = vmatpush3.msra.mxu0 %v1252_v60 }
 0x60e   :  { %v1162_v54 = vpop.f32.mrf.mxu0 }
 0x60f   :  { %v1163_v55 = vadd.f32 %v1564_v53, %v1162_v54 }
 0x610   :  { %v1807_v56 = vpop.f32.mrf.mxu0 }
 0x611   :  { %v1166_v57 = vmax.f32 %v1163_v55, 0.0 }
 0x613   :  { %1817 = vmatmul.mubr.msk.f32.vlgmr.msra.gmra.mxu1 %vm1092_vm8, %v1166_v57 }
 0x6d3   :  { %v1247_v62 = vpop.f32.mrf.mxu1 }
 0x6d4   :  { %v1248_v63 = vadd.f32 %v1566_v61, %v1247_v62 }
 0x6d5   :  { %v1818_v0 = vpop.f32.mrf.mxu1 }
 0x6d6   :  { %v1251_v1 = vmax.f32 %v1248_v63, 0.0 }
 0x6d8   :  { %1828 = vmatmul.mubr.msk.f32.vlgmr.msra.gmra.mxu0 %vm1092_vm8, %v1251_v1 }
 0x798   :  { %v1332_v2 = vpop.f32.mrf.mxu0 }
 0x799   :  { %v1333_v4 = vadd.f32 %v1568_v3, %v1332_v2 }
 0x79a   :  { %v1829_v5 = vpop.f32.mrf.mxu0 }
 0x79b   :  { %1860 = vtanh.f32 %v1333_v4 }
 0x7a8   :  { %v2380_v6 = vpop.eup %1860 }
 0x7a9   :  { %v1337_v7 = vadd.f32 1.0, %v2380_v6 }
 0x7ab   :  { %v1338_v8 = vmul.f32 6.0, %v1337_v7 }
 0x7ad   :  { %v1339_v9 = vadd.f32 -10.0, %v1338_v8 }
 0x7af   :  { %v1340_v10 = vmul.f32 1.442695, %v1339_v9  ;;  %v1405_v17 = vrot.slane %v1339_v9, %v2383_v16 }
 0x7b1   :  { %1862 = vpow2.f32 %v1340_v10  ;;  %v1406_v22 = vcombine.high %v1405_v17, %v1405_v17  ;;  %v1413_v25 = vrot.slane %v1405_v17, %v2383_v16 }
 0x7b3   :  { %v1420_v24 = vrot.slane %v1406_v22, %v2383_v16 }
 0x7be   :  { %v1863_v18 = vpop.eup %1862 }
 0x7bf   :  { %v1351_v19 = vrot.slane %v1863_v18, %v2383_v16 }
 0x7c1   :  { %v1359_v20 = vrot.slane %v1351_v19, %v2383_v16  ;;  %v1352_v21 = vcombine.high %v1351_v19, %v1351_v19 }
 0x7c3   :  { %1367 = vrot.lane.b32.xlu0 %v1359_v20, %s1893_s13  ;;  %v1366_v23 = vrot.slane %v1352_v21, %v2383_v16 }
 0x7c5   :  { %1369 = vrot.lane.b32.xlu1 %v1366_v23, %s1893_s13 }
 0x7c7   :  { %1423 = vrot.lane.b32.xlu0 %v1420_v24, %s1893_s13 }
 0x7c9   :  { %1421 = vrot.lane.b32.xlu1 %v1413_v25, %s1893_s13 }
 0x835   :  { %v1368_v30 = vpop.permute.xlu0 %1367 }
 0x836   :  { %v1373_v32 = vmul.f32 %v1368_v30, %v1342_v27 }
 0x837   :  { %v1370_v31 = vpop.permute.xlu1 %1369 }
 0x838   :  { %v1374_v33 = vmul.f32 %v1370_v31, %v1343_v26 }
 0x839   :  { %v1424_v36 = vpop.permute.xlu0 %1423 }
 0x83a   :  { %v1377_v37 = vcombine.low %v1373_v32, %v1374_v33  ;;  %v1428_v40 = vsub.f32 %v1397_v34, %v1424_v36 }
 0x83b   :  { %v1422_v38 = vpop.permute.xlu1 %1421 }
 0x83c   :  { %v1384_v39 = vrot.slane %v1377_v37, %v2383_v16  ;;  %v1427_v41 = vsub.f32 %v1396_v35, %v1422_v38 }
 0x83e   :  { %v1391_v42 = vrot.slane %v1384_v39, %v2383_v16  ;;  %v1431_v43 = vcombine.low %v1427_v41, %v1428_v40 }
 0x840   :  { %v1393_v44 = vadd.f32 %v1391_v42, %v1333_v4  ;;  %v1438_v45 = vrot.slane %v1431_v43, %v2383_v16 }
 0x842   :  { %1864 = vtanh.f32 %v1393_v44  ;;  %v1445_v46 = vrot.slane %v1438_v45, %v2383_v16 }
 0x844   :  { %v1448_v47 = vsel %vm1447_vm9, %v1445_v46, 0.0 }
 0x845   :  { %1449 = vadd.xlane.f32.xlu1 %v1448_v47 }
 0x84f   :  { %v1865_v48 = vpop.eup %1864 }
 0x850   :  { %v1453_v49 = vmul.f32 %v1865_v48, %v1865_v48 }
 0x852   :  { %v1454_v50 = vsub.f32 1.0, %v1453_v49 }
 0x854   :  { %v1455_v51 = vmax.f32 %v1454_v50, 0.0 }
 0x856   :  { %1467 = vrot.lane.b32.xlu1 %v1339_v9, %s1894_s1  ;;  %v1456_v52 = vadd.f32 1e-06, %v1455_v51 }
 0x858   :  { %1866 = vlog2.f32 %v1456_v52 }
 0x865   :  { %v1867_v53 = vpop.eup %1866 }
 0x866   :  { %v1458_v54 = vmul.f32 0.6931472, %v1867_v53 }
 0x868   :  { %v1459_v55 = vsel %vm1447_vm9, %v1458_v54, 0.0 }
 0x869   :  { %1460 = vadd.xlane.f32.xlu0 %v1459_v55 }
 0x87f   :  { %1464 = vrot.lane.b32.xlu0 %v1865_v48, %s1894_s1 }
 0x8ce   :  { %v1450_v56 = vpop.xlane.xlu1 %1449 }
 0x8cf   :  { %v1570_v58 = vadd.f32 -5.5136313, %v1450_v56 }
 0x8d2   :  { %v1468_v60 = vpop.permute.xlu1 %1467 }
 0x8f2   :  { %v1461_v57 = vpop.xlane.xlu0 %1460 }
 0x8f3   :  { %v1462_v61 = vsub.f32 %v1570_v58, %v1461_v57 }
 0x8f6   :  { %v1465_v59 = vpop.permute.xlu0 %1464 }
 0x8f7   :  { %v1471_v62 = vsel %vm1470_vm10, %v2380_v6, %v1465_v59 }
 0x8f8   :  { %v1473_v63 = vsel %vm1472_vm11, %v1471_v62, %v1468_v60 }
 0x8f9   :  { %v1475_v0 = vsel %vm1474_vm12, %v1473_v63, %v1462_v61 }
 0x8fa   :  { %v1483_v1 = vrot.slane %v1475_v0, %v2383_v16 }
 0x8fc   :  { %v1484_v3 = vcombine.high %v1483_v1, %v1483_v1  ;;  %v1491_v2 = vrot.slane %v1483_v1, %v2383_v16 }
 0x8fe   :  { %v1498_v4 = vrot.slane %v1484_v3, %v2383_v16  ;;  %1502 = vst.msk [vmem:[%s2427_s16] sm:$0x1] %vm1501_vm13, %v1491_v2 }
 0x900   :  { %1503 = vst.msk [vmem:[%s2427_s16 + $0x1] sm:$0x1] %vm1501_vm13, %v1498_v4 }

</bundles_post_ra>
